<compile_context>
chip_gen: v7x
topology: tpu7x:2x2x1
jax: 0.10.0
libtpu: 0.0.40
codegen_flags: <defaults>
</compile_context>

<pallas_src>
import jax
import jax.numpy as jnp
from jax.experimental import pallas as pl
from jax.experimental.pallas import tpu as pltpu

GUARD = 128  # lane-aligned guard columns around the tap-shift staging scratch


# ----------------------------------------------------------------------------
# Fused DeepSpectra forward (one pallas_call)
# ----------------------------------------------------------------------------
def deepspectra_forward(params, x):
    n, c_in, l_in = x.shape
    assert c_in == 1
    k1, s1 = 5, 3
    l_out = (l_in - k1) // s1 + 1                    # conv1 output length (689)
    lp = ((l_out + 4 + 127) // 128) * 128            # lane-dense per-sample pitch
    nlp = n * lp
    assert lp - l_out >= 2, "need >=2 pad lanes per sample for the tap shifts"
    f32, bf16 = jnp.float32, jnp.bfloat16
    g = GUARD

    # ---------------- host-side prep (tiny, fused into the jit) -------------
    # conv1 tap gather (stride 3): taps[k][i] = x[3*i + k]
    taps = [jax.lax.slice(x, (0, 0, k), (n, 1, k + s1 * (l_out - 1) + 1),
                          (1, 1, s1)) for k in range(k1)]
    xs = jnp.concatenate(taps, axis=1)                               # (n, 5, L)
    xs = jnp.pad(xs, ((0, 0), (0, 8 - k1), (0, lp - l_out)))         # (n, 8, LP)
    xs = jnp.transpose(xs, (1, 0, 2)).reshape(8, nlp).astype(f32)    # (8, N*LP)

    # Fold conv1 into the fused 1x1 block (p1a | p2a | shortcut) + keep raw
    # conv1 rows for the maxpool branch.  One matmul produces all of them.
    w1 = params["conv1_w"].reshape(4, k1).astype(f32)                # (4, 5)
    b1 = params["conv1_b"].reshape(4, 1).astype(f32)
    w1x1 = jnp.concatenate([params["p1a_w"].reshape(8, 4),
                            params["p2a_w"].reshape(8, 4),
                            params["sc_w"].reshape(24, 4)], 0).astype(f32)
    b1x1 = jnp.concatenate([params["p1a_b"].reshape(8, 1),
                            params["p2a_b"].reshape(8, 1),
                            jnp.zeros((24, 1), f32)], 0).astype(f32)
    w_fused = w1x1 @ w1                                              # (40, 5)
    b_fused = w1x1 @ b1 + b1x1                                       # (40, 1)
    # rows 0:8 p1a | 8:16 p2a | 16:40 shortcut | 40:44 conv1 (h) | 44:48 zero
    w_big = jnp.pad(jnp.concatenate([w_fused, w1], 0), ((0, 4), (0, 8 - k1)))
    b_big = jnp.concatenate([b_fused, b1, jnp.zeros((4, 1), f32)], 0)

    def tap_rows(w):      # (8, c_in, K) -> (K*8, 8) tap-major, zero-padded cols
        c_out, ci, kk = w.shape
        wt = jnp.transpose(w, (2, 0, 1)).astype(f32)
        wt = jnp.pad(wt, ((0, 0), (0, 0), (0, 8 - ci)))
        return wt.reshape(kk * c_out, 8)

    def col8(v):          # (r, 1) -> (r, 8), payload in column 0
        return jnp.pad(v.astype(f32), ((0, 0), (0, 7)))

    fcb = params["fc_b"].reshape(1, 1).astype(f32)

    # one flat weight slab (all matmul LHS blocks + all biases): (216, 8) f32
    r_wbig, r_w1b, r_w2b, r_w3 = 0, 48, 72, 112
    r_bbig, r_b1b, r_b2b, r_b3, r_fcb = 136, 184, 192, 200, 208
    wslab = jnp.concatenate([
        w_big,                                   # rows   0: 48
        tap_rows(params["p1b_w"]),               # rows  48: 72  (3 taps x 8)
        tap_rows(params["p2b_w"]),               # rows  72:112  (5 taps x 8)
        tap_rows(params["p3_w"]),                # rows 112:136  (3 taps x 8)
        col8(b_big),                             # rows 136:184
        col8(params["p1b_b"].reshape(8, 1)),     # rows 184:192
        col8(params["p2b_b"].reshape(8, 1)),     # rows 192:200
        col8(params["p3_b"].reshape(8, 1)),      # rows 200:208
        col8(jnp.pad(fcb, ((0, 7), (0, 0)))),    # rows 208:216
    ], axis=0)

    # lane slab: rows 0:8 conv1 taps, rows 8:32 fc weight (zero on pad lanes,
    # pre-tiled across the batch so the head is one multiply + reductions).
    fcw = jnp.pad(params["fc_w"].reshape(24, l_out).astype(f32),
                  ((0, 0), (0, lp - l_out)))
    lane_slab = jnp.concatenate([xs, jnp.tile(fcw, (1, n))], axis=0)  # (32, N*LP)

    # ---------------------------- fused kernel ------------------------------
    def kernel(lane_ref, w_ref, o_ref, sbuf):
        lane = jax.lax.broadcasted_iota(jnp.int32, (1, nlp), 1)
        valid = lane < l_out                         # per-sample valid-lane mask
        for b in range(1, n):
            valid = valid | ((lane >= b * lp) & (lane < b * lp + l_out))

        def mm(a, b_):                               # bf16 in / f32 acc, 1 MXU pass
            return jnp.dot(a.astype(bf16), b_.astype(bf16),
                           preferred_element_type=jnp.float32)

        def stage(val, fill):                        # park a (8, N*LP) shift operand
            sbuf[:, 0:g] = jnp.full((8, g), fill, f32)
            sbuf[:, g + nlp:g + nlp + g] = jnp.full((8, g), fill, f32)
            sbuf[:, g:g + nlp] = val

        def tap(s):                                  # tap(s)[:, i] == staged[:, i - s]
            return sbuf[:, g - s:g - s + nlp]

        def wrow(r0, rows=8):
            return w_ref[r0:r0 + rows, :]

        def bias(r0, rows=8):
            return w_ref[r0:r0 + rows, 0:1]

        xs_k = lane_ref[0:8, :]                      # (8, N*LP) conv1 taps
        fcw_k = lane_ref[8:32, :]                    # (24, N*LP) fc weight (0 on pads)

        # conv1 + p1a + p2a + shortcut + h in ONE matmul (conv1 folded host-side)
        z = mm(wrow(r_wbig, 48), xs_k) + bias(r_bbig, 48)            # (48, N*LP)
        p1a = jnp.where(valid, z[0:8], 0.0)          # zero pads == conv zero padding
        p2a = jnp.where(valid, z[8:16], 0.0)
        sc = z[16:40]                                # pads nonzero; fcw pads are 0
        h = z[40:48]                                 # rows 4:8 are exactly zero

        def tap_conv(val, w_r0, ksz, pad, b_r0):     # Conv1d(kernel=ksz, padding=pad)
            stage(val, 0.0)
            acc = bias(b_r0)
            for k in range(ksz):                     # static unroll, <=5 MXU matmuls
                s = pad - k
                acc = acc + mm(wrow(w_r0 + 8 * k), val if s == 0 else tap(s))
            return acc

        p1 = tap_conv(p1a, r_w1b, 3, 1, r_b1b)       # Conv1d(8, 8, 3, pad=1)
        p2 = tap_conv(p2a, r_w2b, 5, 2, r_b2b)       # Conv1d(8, 8, 5, pad=2)

        # p3: MaxPool1d(3, stride=1, pad=1) (-inf padding), then Conv1d(4, 8, 3, pad=1)
        hp = jnp.where(valid, h, -jnp.inf)
        stage(hp, -jnp.inf)
        mp = jnp.where(valid, jnp.maximum(jnp.maximum(tap(1), hp), tap(-1)), 0.0)
        p3 = tap_conv(mp, r_w3, 3, 1, r_b3)

        # Residual add per branch + fc head partials (no concat materialization).
        # NOTE: pad lanes of p1/p2/p3/sc are nonzero; correctness relies on fcw_k
        # being exactly zero on pad lanes (constructed that way host-side).
        t = ((p1 + sc[0:8]) * fcw_k[0:8]
             + (p2 + sc[8:16]) * fcw_k[8:16]
             + (p3 + sc[16:24]) * fcw_k[16:24])      # (8, N*LP) f32
        col = jnp.sum(t, axis=0, keepdims=True)      # (1, N*LP) sublane reduce

        lane_n = jax.lax.broadcasted_iota(jnp.int32, (1, n), 1)
        res = jnp.zeros((1, n), f32)
        for b in range(n):                           # static unroll over small batch
            r_b = jnp.sum(col[:, b * lp:(b + 1) * lp], axis=1, keepdims=True)
            res = res + jnp.where(lane_n == b, r_b, 0.0)
        o_ref[...] = res + bias(r_fcb, 1)            # single lane-dense store

    vmem = pl.BlockSpec(memory_space=pltpu.MemorySpace.VMEM)
    out = pl.pallas_call(
        kernel,
        out_shape=jax.ShapeDtypeStruct((1, n), f32),
        in_specs=[vmem, vmem],
        out_specs=vmem,
        scratch_shapes=[pltpu.VMEM((8, g + nlp + g), f32)],
    )(lane_slab, wslab)
    # For large batch / v7x dual-TC a batch grid axis would replace the packed
    # N*LP slab; at N=2 the grid-less fused kernel is the latency-optimal shape.
    return out.reshape(n, 1)


# ----------------------------------------------------------------------------
# Pure-JAX reference (for self-check)
# ----------------------------------------------------------------------------
def conv1d_ref(x, w, b=None, *, stride=1, padding=0):
    out = jax.lax.conv_general_dilated(
        x, w, window_strides=(stride,), padding=[(padding, padding)],
        dimension_numbers=("NCH", "OIH", "NCH"),
        precision=jax.lax.Precision.HIGHEST)
    if b is not None:
        out = out + b[None, :, None]
    return out


def deepspectra_reference(params, x):
    h = conv1d_ref(x, params["conv1_w"], params["conv1_b"], stride=3)
    p1 = conv1d_ref(conv1d_ref(h, params["p1a_w"], params["p1a_b"]),
                    params["p1b_w"], params["p1b_b"], padding=1)
    p2 = conv1d_ref(conv1d_ref(h, params["p2a_w"], params["p2a_b"]),
                    params["p2b_w"], params["p2b_b"], padding=2)
    mp = jax.lax.reduce_window(h, -jnp.inf, jax.lax.max,
                               (1, 1, 3), (1, 1, 1),
                               [(0, 0), (0, 0), (1, 1)])
    p3 = conv1d_ref(mp, params["p3_w"], params["p3_b"], padding=1)
    sc = conv1d_ref(h, params["sc_w"])
    out = jnp.concatenate([p1, p2, p3], axis=1) + sc
    flat = out.reshape(out.shape[0], -1)
    return (jnp.dot(flat, params["fc_w"].T, precision=jax.lax.Precision.HIGHEST)
            + params["fc_b"][None, :])


# ----------------------------------------------------------------------------
# Deterministic parameter init (shapes from DeepSpectra.__init__)
# ----------------------------------------------------------------------------
def init_params(key):
    ks = jax.random.split(key, 16)

    def w(i, shape, scale):
        return scale * jax.random.normal(ks[i], shape, jnp.float32)

    return {
        "conv1_w": w(0, (4, 1, 5), 0.2), "conv1_b": w(1, (4,), 0.2),
        "p1a_w": w(2, (8, 4, 1), 0.2), "p1a_b": w(3, (8,), 0.2),
        "p1b_w": w(4, (8, 8, 3), 0.2), "p1b_b": w(5, (8,), 0.2),
        "p2a_w": w(6, (8, 4, 1), 0.2), "p2a_b": w(7, (8,), 0.2),
        "p2b_w": w(8, (8, 8, 5), 0.2), "p2b_b": w(9, (8,), 0.2),
        "p3_w": w(10, (8, 4, 3), 0.2), "p3_b": w(11, (8,), 0.2),
        "sc_w": w(12, (24, 4, 1), 0.2),
        "fc_w": w(13, (1, 24 * 689), 0.02), "fc_b": w(14, (1,), 0.02),
    }


if __name__ == "__main__":
    key = jax.random.PRNGKey(0)
    k_x, k_p = jax.random.split(key)
    # DeepSpectra.fc is Linear(16536, 1) = Linear(24 * 689, 1); with
    # conv1 = Conv1d(1, 4, k=5, stride=3) that implies input length 2069.
    n, l_in = 2, 2069
    x = jax.random.normal(k_x, (n, 1, l_in), jnp.float32)
    params = init_params(k_p)

    fwd = jax.jit(deepspectra_forward)
    out = jax.block_until_ready(fwd(params, x))
    assert out.shape == (n, 1) and out.dtype == jnp.float32

    ref = jax.block_until_ready(deepspectra_reference(params, x))
    # bf16-in / f32-acc matmuls in the kernel vs f32 HIGHEST reference ->
    # slightly loosened tolerance (per review).
    if not jnp.allclose(out, ref, rtol=5e-2, atol=1e-1):
        raise AssertionError(f"mismatch:\npallas={out}\nref={ref}")
    print("KERNEL_OK")
</pallas_src>

<mosaic_0001>
module attributes {stable_mosaic.version = 11 : i64} {
  func.func @kernel(%arg0: memref<32x1536xf32, #tpu.memory_space<vmem>>, %arg1: memref<216x8xf32, #tpu.memory_space<vmem>>, %arg2: memref<1x2xf32, #tpu.memory_space<vmem>>, %arg3: memref<8x1792xf32, #tpu.memory_space<vmem>>) attributes {dimension_semantics = [], scalar_prefetch = 0 : i64, scratch_operands = 1 : i64, tpu.core_type = #tpu.core_type<tc>} {
    %0 = tpu.iota {dimensions = array<i32: 1>} : vector<1x1536xi32>
    %c689_i32 = arith.constant 689 : i32
    %1 = vector.broadcast %c689_i32 : i32 to vector<1x1536xi32>
    %2 = arith.cmpi slt, %0, %1 : vector<1x1536xi32>
    %c768_i32 = arith.constant 768 : i32
    %3 = vector.broadcast %c768_i32 : i32 to vector<1x1536xi32>
    %4 = arith.cmpi sge, %0, %3 : vector<1x1536xi32>
    %c1457_i32 = arith.constant 1457 : i32
    %5 = vector.broadcast %c1457_i32 : i32 to vector<1x1536xi32>
    %6 = arith.cmpi slt, %0, %5 : vector<1x1536xi32>
    %7 = arith.andi %4, %6 : vector<1x1536xi1>
    %8 = arith.ori %2, %7 : vector<1x1536xi1>
    %c0 = arith.constant 0 : index
    %c0_0 = arith.constant 0 : index
    %9 = vector.load %arg0[%c0, %c0_0] : memref<32x1536xf32, #tpu.memory_space<vmem>>, vector<8x1536xf32>
    %c8 = arith.constant 8 : index
    %c0_1 = arith.constant 0 : index
    %10 = vector.load %arg0[%c8, %c0_1] : memref<32x1536xf32, #tpu.memory_space<vmem>>, vector<24x1536xf32>
    %c0_2 = arith.constant 0 : index
    %c0_3 = arith.constant 0 : index
    %11 = vector.load %arg1[%c0_2, %c0_3] : memref<216x8xf32, #tpu.memory_space<vmem>>, vector<48x8xf32>
    %12 = arith.truncf %11 : vector<48x8xf32> to vector<48x8xbf16>
    %13 = arith.truncf %9 : vector<8x1536xf32> to vector<8x1536xbf16>
    %cst = arith.constant dense<0.000000e+00> : vector<48x1536xf32>
    %14 = tpu.matmul %12, %13, %cst {dimension_numbers = #tpu.dot_dimension_numbers<[1], [0], [0], [1], [0, 0, 1, 1], [], []>} : vector<48x8xbf16>, vector<8x1536xbf16>, vector<48x1536xf32> -> vector<48x1536xf32>
    %c136 = arith.constant 136 : index
    %c0_4 = arith.constant 0 : index
    %15 = vector.load %arg1[%c136, %c0_4] : memref<216x8xf32, #tpu.memory_space<vmem>>, vector<48x1xf32>
    %16 = vector.broadcast %15 : vector<48x1xf32> to vector<48x1536xf32>
    %17 = arith.addf %14, %16 : vector<48x1536xf32>
    %18 = vector.extract_strided_slice %17 {offsets = [0, 0], sizes = [8, 1536], strides = [1, 1]} : vector<48x1536xf32> to vector<8x1536xf32>
    %cst_5 = arith.constant 0.000000e+00 : f32
    %19 = vector.shape_cast %8 : vector<1x1536xi1> to vector<1x1536xi1>
    %20 = vector.broadcast %19 : vector<1x1536xi1> to vector<8x1536xi1>
    %21 = vector.broadcast %cst_5 : f32 to vector<8x1536xf32>
    %22 = arith.select %20, %18, %21 : vector<8x1536xi1>, vector<8x1536xf32>
    %23 = vector.extract_strided_slice %17 {offsets = [8, 0], sizes = [8, 1536], strides = [1, 1]} : vector<48x1536xf32> to vector<8x1536xf32>
    %cst_6 = arith.constant 0.000000e+00 : f32
    %24 = vector.shape_cast %8 : vector<1x1536xi1> to vector<1x1536xi1>
    %25 = vector.broadcast %24 : vector<1x1536xi1> to vector<8x1536xi1>
    %26 = vector.broadcast %cst_6 : f32 to vector<8x1536xf32>
    %27 = arith.select %25, %23, %26 : vector<8x1536xi1>, vector<8x1536xf32>
    %28 = vector.extract_strided_slice %17 {offsets = [16, 0], sizes = [24, 1536], strides = [1, 1]} : vector<48x1536xf32> to vector<24x1536xf32>
    %29 = vector.extract_strided_slice %17 {offsets = [40, 0], sizes = [8, 1536], strides = [1, 1]} : vector<48x1536xf32> to vector<8x1536xf32>
    %cst_7 = arith.constant 0.000000e+00 : f32
    %30 = vector.broadcast %cst_7 : f32 to vector<8x128xf32>
    %c0_8 = arith.constant 0 : index
    %c0_9 = arith.constant 0 : index
    %31 = vector.load %arg3[%c0_8, %c0_9] : memref<8x1792xf32, #tpu.memory_space<vmem>>, vector<8x128xf32>
    tpu.vector_store %arg3[%c0_8, %c0_9], %30 {strides = array<i32>} : memref<8x1792xf32, #tpu.memory_space<vmem>>, vector<8x128xf32>,
    %cst_10 = arith.constant 0.000000e+00 : f32
    %32 = vector.broadcast %cst_10 : f32 to vector<8x128xf32>
    %c0_11 = arith.constant 0 : index
    %c1664 = arith.constant 1664 : index
    %33 = vector.load %arg3[%c0_11, %c1664] : memref<8x1792xf32, #tpu.memory_space<vmem>>, vector<8x128xf32>
    tpu.vector_store %arg3[%c0_11, %c1664], %32 {strides = array<i32>} : memref<8x1792xf32, #tpu.memory_space<vmem>>, vector<8x128xf32>,
    %c0_12 = arith.constant 0 : index
    %c128 = arith.constant 128 : index
    %34 = vector.load %arg3[%c0_12, %c128] : memref<8x1792xf32, #tpu.memory_space<vmem>>, vector<8x1536xf32>
    tpu.vector_store %arg3[%c0_12, %c128], %22 {strides = array<i32>} : memref<8x1792xf32, #tpu.memory_space<vmem>>, vector<8x1536xf32>,
    %c184 = arith.constant 184 : index
    %c0_13 = arith.constant 0 : index
    %35 = vector.load %arg1[%c184, %c0_13] : memref<216x8xf32, #tpu.memory_space<vmem>>, vector<8x1xf32>
    %c48 = arith.constant 48 : index
    %c0_14 = arith.constant 0 : index
    %36 = vector.load %arg1[%c48, %c0_14] : memref<216x8xf32, #tpu.memory_space<vmem>>, vector<8x8xf32>
    %c0_15 = arith.constant 0 : index
    %c127 = arith.constant 127 : index
    %37 = vector.load %arg3[%c0_15, %c127] : memref<8x1792xf32, #tpu.memory_space<vmem>>, vector<8x1536xf32>
    %38 = arith.truncf %36 : vector<8x8xf32> to vector<8x8xbf16>
    %39 = arith.truncf %37 : vector<8x1536xf32> to vector<8x1536xbf16>
    %cst_16 = arith.constant dense<0.000000e+00> : vector<8x1536xf32>
    %40 = tpu.matmul %38, %39, %cst_16 {dimension_numbers = #tpu.dot_dimension_numbers<[1], [0], [0], [1], [0, 0, 1, 1], [], []>} : vector<8x8xbf16>, vector<8x1536xbf16>, vector<8x1536xf32> -> vector<8x1536xf32>
    %41 = vector.broadcast %35 : vector<8x1xf32> to vector<8x1536xf32>
    %42 = arith.addf %41, %40 : vector<8x1536xf32>
    %c56 = arith.constant 56 : index
    %c0_17 = arith.constant 0 : index
    %43 = vector.load %arg1[%c56, %c0_17] : memref<216x8xf32, #tpu.memory_space<vmem>>, vector<8x8xf32>
    %44 = arith.truncf %43 : vector<8x8xf32> to vector<8x8xbf16>
    %45 = arith.truncf %22 : vector<8x1536xf32> to vector<8x1536xbf16>
    %cst_18 = arith.constant dense<0.000000e+00> : vector<8x1536xf32>
    %46 = tpu.matmul %44, %45, %cst_18 {dimension_numbers = #tpu.dot_dimension_numbers<[1], [0], [0], [1], [0, 0, 1, 1], [], []>} : vector<8x8xbf16>, vector<8x1536xbf16>, vector<8x1536xf32> -> vector<8x1536xf32>
    %47 = arith.addf %42, %46 : vector<8x1536xf32>
    %c64 = arith.constant 64 : index
    %c0_19 = arith.constant 0 : index
    %48 = vector.load %arg1[%c64, %c0_19] : memref<216x8xf32, #tpu.memory_space<vmem>>, vector<8x8xf32>
    %c0_20 = arith.constant 0 : index
    %c129 = arith.constant 129 : index
    %49 = vector.load %arg3[%c0_20, %c129] : memref<8x1792xf32, #tpu.memory_space<vmem>>, vector<8x1536xf32>
    %50 = arith.truncf %48 : vector<8x8xf32> to vector<8x8xbf16>
    %51 = arith.truncf %49 : vector<8x1536xf32> to vector<8x1536xbf16>
    %cst_21 = arith.constant dense<0.000000e+00> : vector<8x1536xf32>
    %52 = tpu.matmul %50, %51, %cst_21 {dimension_numbers = #tpu.dot_dimension_numbers<[1], [0], [0], [1], [0, 0, 1, 1], [], []>} : vector<8x8xbf16>, vector<8x1536xbf16>, vector<8x1536xf32> -> vector<8x1536xf32>
    %53 = arith.addf %47, %52 : vector<8x1536xf32>
    %cst_22 = arith.constant 0.000000e+00 : f32
    %54 = vector.broadcast %cst_22 : f32 to vector<8x128xf32>
    %c0_23 = arith.constant 0 : index
    %c0_24 = arith.constant 0 : index
    %55 = vector.load %arg3[%c0_23, %c0_24] : memref<8x1792xf32, #tpu.memory_space<vmem>>, vector<8x128xf32>
    tpu.vector_store %arg3[%c0_23, %c0_24], %54 {strides = array<i32>} : memref<8x1792xf32, #tpu.memory_space<vmem>>, vector<8x128xf32>,
    %cst_25 = arith.constant 0.000000e+00 : f32
    %56 = vector.broadcast %cst_25 : f32 to vector<8x128xf32>
    %c0_26 = arith.constant 0 : index
    %c1664_27 = arith.constant 1664 : index
    %57 = vector.load %arg3[%c0_26, %c1664_27] : memref<8x1792xf32, #tpu.memory_space<vmem>>, vector<8x128xf32>
    tpu.vector_store %arg3[%c0_26, %c1664_27], %56 {strides = array<i32>} : memref<8x1792xf32, #tpu.memory_space<vmem>>, vector<8x128xf32>,
    %c0_28 = arith.constant 0 : index
    %c128_29 = arith.constant 128 : index
    %58 = vector.load %arg3[%c0_28, %c128_29] : memref<8x1792xf32, #tpu.memory_space<vmem>>, vector<8x1536xf32>
    tpu.vector_store %arg3[%c0_28, %c128_29], %27 {strides = array<i32>} : memref<8x1792xf32, #tpu.memory_space<vmem>>, vector<8x1536xf32>,
    %c192 = arith.constant 192 : index
    %c0_30 = arith.constant 0 : index
    %59 = vector.load %arg1[%c192, %c0_30] : memref<216x8xf32, #tpu.memory_space<vmem>>, vector<8x1xf32>
    %c72 = arith.constant 72 : index
    %c0_31 = arith.constant 0 : index
    %60 = vector.load %arg1[%c72, %c0_31] : memref<216x8xf32, #tpu.memory_space<vmem>>, vector<8x8xf32>
    %c0_32 = arith.constant 0 : index
    %c126 = arith.constant 126 : index
    %61 = vector.load %arg3[%c0_32, %c126] : memref<8x1792xf32, #tpu.memory_space<vmem>>, vector<8x1536xf32>
    %62 = arith.truncf %60 : vector<8x8xf32> to vector<8x8xbf16>
    %63 = arith.truncf %61 : vector<8x1536xf32> to vector<8x1536xbf16>
    %cst_33 = arith.constant dense<0.000000e+00> : vector<8x1536xf32>
    %64 = tpu.matmul %62, %63, %cst_33 {dimension_numbers = #tpu.dot_dimension_numbers<[1], [0], [0], [1], [0, 0, 1, 1], [], []>} : vector<8x8xbf16>, vector<8x1536xbf16>, vector<8x1536xf32> -> vector<8x1536xf32>
    %65 = vector.broadcast %59 : vector<8x1xf32> to vector<8x1536xf32>
    %66 = arith.addf %65, %64 : vector<8x1536xf32>
    %c80 = arith.constant 80 : index
    %c0_34 = arith.constant 0 : index
    %67 = vector.load %arg1[%c80, %c0_34] : memref<216x8xf32, #tpu.memory_space<vmem>>, vector<8x8xf32>
    %c0_35 = arith.constant 0 : index
    %c127_36 = arith.constant 127 : index
    %68 = vector.load %arg3[%c0_35, %c127_36] : memref<8x1792xf32, #tpu.memory_space<vmem>>, vector<8x1536xf32>
    %69 = arith.truncf %67 : vector<8x8xf32> to vector<8x8xbf16>
    %70 = arith.truncf %68 : vector<8x1536xf32> to vector<8x1536xbf16>
    %cst_37 = arith.constant dense<0.000000e+00> : vector<8x1536xf32>
    %71 = tpu.matmul %69, %70, %cst_37 {dimension_numbers = #tpu.dot_dimension_numbers<[1], [0], [0], [1], [0, 0, 1, 1], [], []>} : vector<8x8xbf16>, vector<8x1536xbf16>, vector<8x1536xf32> -> vector<8x1536xf32>
    %72 = arith.addf %66, %71 : vector<8x1536xf32>
    %c88 = arith.constant 88 : index
    %c0_38 = arith.constant 0 : index
    %73 = vector.load %arg1[%c88, %c0_38] : memref<216x8xf32, #tpu.memory_space<vmem>>, vector<8x8xf32>
    %74 = arith.truncf %73 : vector<8x8xf32> to vector<8x8xbf16>
    %75 = arith.truncf %27 : vector<8x1536xf32> to vector<8x1536xbf16>
    %cst_39 = arith.constant dense<0.000000e+00> : vector<8x1536xf32>
    %76 = tpu.matmul %74, %75, %cst_39 {dimension_numbers = #tpu.dot_dimension_numbers<[1], [0], [0], [1], [0, 0, 1, 1], [], []>} : vector<8x8xbf16>, vector<8x1536xbf16>, vector<8x1536xf32> -> vector<8x1536xf32>
    %77 = arith.addf %72, %76 : vector<8x1536xf32>
    %c96 = arith.constant 96 : index
    %c0_40 = arith.constant 0 : index
    %78 = vector.load %arg1[%c96, %c0_40] : memref<216x8xf32, #tpu.memory_space<vmem>>, vector<8x8xf32>
    %c0_41 = arith.constant 0 : index
    %c129_42 = arith.constant 129 : index
    %79 = vector.load %arg3[%c0_41, %c129_42] : memref<8x1792xf32, #tpu.memory_space<vmem>>, vector<8x1536xf32>
    %80 = arith.truncf %78 : vector<8x8xf32> to vector<8x8xbf16>
    %81 = arith.truncf %79 : vector<8x1536xf32> to vector<8x1536xbf16>
    %cst_43 = arith.constant dense<0.000000e+00> : vector<8x1536xf32>
    %82 = tpu.matmul %80, %81, %cst_43 {dimension_numbers = #tpu.dot_dimension_numbers<[1], [0], [0], [1], [0, 0, 1, 1], [], []>} : vector<8x8xbf16>, vector<8x1536xbf16>, vector<8x1536xf32> -> vector<8x1536xf32>
    %83 = arith.addf %77, %82 : vector<8x1536xf32>
    %c104 = arith.constant 104 : index
    %c0_44 = arith.constant 0 : index
    %84 = vector.load %arg1[%c104, %c0_44] : memref<216x8xf32, #tpu.memory_space<vmem>>, vector<8x8xf32>
    %c0_45 = arith.constant 0 : index
    %c130 = arith.constant 130 : index
    %85 = vector.load %arg3[%c0_45, %c130] : memref<8x1792xf32, #tpu.memory_space<vmem>>, vector<8x1536xf32>
    %86 = arith.truncf %84 : vector<8x8xf32> to vector<8x8xbf16>
    %87 = arith.truncf %85 : vector<8x1536xf32> to vector<8x1536xbf16>
    %cst_46 = arith.constant dense<0.000000e+00> : vector<8x1536xf32>
    %88 = tpu.matmul %86, %87, %cst_46 {dimension_numbers = #tpu.dot_dimension_numbers<[1], [0], [0], [1], [0, 0, 1, 1], [], []>} : vector<8x8xbf16>, vector<8x1536xbf16>, vector<8x1536xf32> -> vector<8x1536xf32>
    %89 = arith.addf %83, %88 : vector<8x1536xf32>
    %cst_47 = arith.constant 0xFF800000 : f32
    %90 = vector.shape_cast %8 : vector<1x1536xi1> to vector<1x1536xi1>
    %91 = vector.broadcast %90 : vector<1x1536xi1> to vector<8x1536xi1>
    %92 = vector.broadcast %cst_47 : f32 to vector<8x1536xf32>
    %93 = arith.select %91, %29, %92 : vector<8x1536xi1>, vector<8x1536xf32>
    %cst_48 = arith.constant 0xFF800000 : f32
    %94 = vector.broadcast %cst_48 : f32 to vector<8x128xf32>
    %c0_49 = arith.constant 0 : index
    %c0_50 = arith.constant 0 : index
    %95 = vector.load %arg3[%c0_49, %c0_50] : memref<8x1792xf32, #tpu.memory_space<vmem>>, vector<8x128xf32>
    tpu.vector_store %arg3[%c0_49, %c0_50], %94 {strides = array<i32>} : memref<8x1792xf32, #tpu.memory_space<vmem>>, vector<8x128xf32>,
    %cst_51 = arith.constant 0xFF800000 : f32
    %96 = vector.broadcast %cst_51 : f32 to vector<8x128xf32>
    %c0_52 = arith.constant 0 : index
    %c1664_53 = arith.constant 1664 : index
    %97 = vector.load %arg3[%c0_52, %c1664_53] : memref<8x1792xf32, #tpu.memory_space<vmem>>, vector<8x128xf32>
    tpu.vector_store %arg3[%c0_52, %c1664_53], %96 {strides = array<i32>} : memref<8x1792xf32, #tpu.memory_space<vmem>>, vector<8x128xf32>,
    %c0_54 = arith.constant 0 : index
    %c128_55 = arith.constant 128 : index
    %98 = vector.load %arg3[%c0_54, %c128_55] : memref<8x1792xf32, #tpu.memory_space<vmem>>, vector<8x1536xf32>
    tpu.vector_store %arg3[%c0_54, %c128_55], %93 {strides = array<i32>} : memref<8x1792xf32, #tpu.memory_space<vmem>>, vector<8x1536xf32>,
    %c0_56 = arith.constant 0 : index
    %c127_57 = arith.constant 127 : index
    %99 = vector.load %arg3[%c0_56, %c127_57] : memref<8x1792xf32, #tpu.memory_space<vmem>>, vector<8x1536xf32>
    %100 = arith.maximumf %99, %93 : vector<8x1536xf32>
    %c0_58 = arith.constant 0 : index
    %c129_59 = arith.constant 129 : index
    %101 = vector.load %arg3[%c0_58, %c129_59] : memref<8x1792xf32, #tpu.memory_space<vmem>>, vector<8x1536xf32>
    %102 = arith.maximumf %100, %101 : vector<8x1536xf32>
    %cst_60 = arith.constant 0.000000e+00 : f32
    %103 = vector.shape_cast %8 : vector<1x1536xi1> to vector<1x1536xi1>
    %104 = vector.broadcast %103 : vector<1x1536xi1> to vector<8x1536xi1>
    %105 = vector.broadcast %cst_60 : f32 to vector<8x1536xf32>
    %106 = arith.select %104, %102, %105 : vector<8x1536xi1>, vector<8x1536xf32>
    %cst_61 = arith.constant 0.000000e+00 : f32
    %107 = vector.broadcast %cst_61 : f32 to vector<8x128xf32>
    %c0_62 = arith.constant 0 : index
    %c0_63 = arith.constant 0 : index
    %108 = vector.load %arg3[%c0_62, %c0_63] : memref<8x1792xf32, #tpu.memory_space<vmem>>, vector<8x128xf32>
    tpu.vector_store %arg3[%c0_62, %c0_63], %107 {strides = array<i32>} : memref<8x1792xf32, #tpu.memory_space<vmem>>, vector<8x128xf32>,
    %cst_64 = arith.constant 0.000000e+00 : f32
    %109 = vector.broadcast %cst_64 : f32 to vector<8x128xf32>
    %c0_65 = arith.constant 0 : index
    %c1664_66 = arith.constant 1664 : index
    %110 = vector.load %arg3[%c0_65, %c1664_66] : memref<8x1792xf32, #tpu.memory_space<vmem>>, vector<8x128xf32>
    tpu.vector_store %arg3[%c0_65, %c1664_66], %109 {strides = array<i32>} : memref<8x1792xf32, #tpu.memory_space<vmem>>, vector<8x128xf32>,
    %c0_67 = arith.constant 0 : index
    %c128_68 = arith.constant 128 : index
    %111 = vector.load %arg3[%c0_67, %c128_68] : memref<8x1792xf32, #tpu.memory_space<vmem>>, vector<8x1536xf32>
    tpu.vector_store %arg3[%c0_67, %c128_68], %106 {strides = array<i32>} : memref<8x1792xf32, #tpu.memory_space<vmem>>, vector<8x1536xf32>,
    %c200 = arith.constant 200 : index
    %c0_69 = arith.constant 0 : index
    %112 = vector.load %arg1[%c200, %c0_69] : memref<216x8xf32, #tpu.memory_space<vmem>>, vector<8x1xf32>
    %c112 = arith.constant 112 : index
    %c0_70 = arith.constant 0 : index
    %113 = vector.load %arg1[%c112, %c0_70] : memref<216x8xf32, #tpu.memory_space<vmem>>, vector<8x8xf32>
    %c0_71 = arith.constant 0 : index
    %c127_72 = arith.constant 127 : index
    %114 = vector.load %arg3[%c0_71, %c127_72] : memref<8x1792xf32, #tpu.memory_space<vmem>>, vector<8x1536xf32>
    %115 = arith.truncf %113 : vector<8x8xf32> to vector<8x8xbf16>
    %116 = arith.truncf %114 : vector<8x1536xf32> to vector<8x1536xbf16>
    %cst_73 = arith.constant dense<0.000000e+00> : vector<8x1536xf32>
    %117 = tpu.matmul %115, %116, %cst_73 {dimension_numbers = #tpu.dot_dimension_numbers<[1], [0], [0], [1], [0, 0, 1, 1], [], []>} : vector<8x8xbf16>, vector<8x1536xbf16>, vector<8x1536xf32> -> vector<8x1536xf32>
    %118 = vector.broadcast %112 : vector<8x1xf32> to vector<8x1536xf32>
    %119 = arith.addf %118, %117 : vector<8x1536xf32>
    %c120 = arith.constant 120 : index
    %c0_74 = arith.constant 0 : index
    %120 = vector.load %arg1[%c120, %c0_74] : memref<216x8xf32, #tpu.memory_space<vmem>>, vector<8x8xf32>
    %121 = arith.truncf %120 : vector<8x8xf32> to vector<8x8xbf16>
    %122 = arith.truncf %106 : vector<8x1536xf32> to vector<8x1536xbf16>
    %cst_75 = arith.constant dense<0.000000e+00> : vector<8x1536xf32>
    %123 = tpu.matmul %121, %122, %cst_75 {dimension_numbers = #tpu.dot_dimension_numbers<[1], [0], [0], [1], [0, 0, 1, 1], [], []>} : vector<8x8xbf16>, vector<8x1536xbf16>, vector<8x1536xf32> -> vector<8x1536xf32>
    %124 = arith.addf %119, %123 : vector<8x1536xf32>
    %c128_76 = arith.constant 128 : index
    %c0_77 = arith.constant 0 : index
    %125 = vector.load %arg1[%c128_76, %c0_77] : memref<216x8xf32, #tpu.memory_space<vmem>>, vector<8x8xf32>
    %c0_78 = arith.constant 0 : index
    %c129_79 = arith.constant 129 : index
    %126 = vector.load %arg3[%c0_78, %c129_79] : memref<8x1792xf32, #tpu.memory_space<vmem>>, vector<8x1536xf32>
    %127 = arith.truncf %125 : vector<8x8xf32> to vector<8x8xbf16>
    %128 = arith.truncf %126 : vector<8x1536xf32> to vector<8x1536xbf16>
    %cst_80 = arith.constant dense<0.000000e+00> : vector<8x1536xf32>
    %129 = tpu.matmul %127, %128, %cst_80 {dimension_numbers = #tpu.dot_dimension_numbers<[1], [0], [0], [1], [0, 0, 1, 1], [], []>} : vector<8x8xbf16>, vector<8x1536xbf16>, vector<8x1536xf32> -> vector<8x1536xf32>
    %130 = arith.addf %124, %129 : vector<8x1536xf32>
    %131 = vector.extract_strided_slice %28 {offsets = [0, 0], sizes = [8, 1536], strides = [1, 1]} : vector<24x1536xf32> to vector<8x1536xf32>
    %132 = arith.addf %53, %131 : vector<8x1536xf32>
    %133 = vector.extract_strided_slice %10 {offsets = [0, 0], sizes = [8, 1536], strides = [1, 1]} : vector<24x1536xf32> to vector<8x1536xf32>
    %134 = arith.mulf %132, %133 : vector<8x1536xf32>
    %135 = vector.extract_strided_slice %28 {offsets = [8, 0], sizes = [8, 1536], strides = [1, 1]} : vector<24x1536xf32> to vector<8x1536xf32>
    %136 = arith.addf %89, %135 : vector<8x1536xf32>
    %137 = vector.extract_strided_slice %10 {offsets = [8, 0], sizes = [8, 1536], strides = [1, 1]} : vector<24x1536xf32> to vector<8x1536xf32>
    %138 = arith.mulf %136, %137 : vector<8x1536xf32>
    %139 = arith.addf %134, %138 : vector<8x1536xf32>
    %140 = vector.extract_strided_slice %28 {offsets = [16, 0], sizes = [8, 1536], strides = [1, 1]} : vector<24x1536xf32> to vector<8x1536xf32>
    %141 = arith.addf %130, %140 : vector<8x1536xf32>
    %142 = vector.extract_strided_slice %10 {offsets = [16, 0], sizes = [8, 1536], strides = [1, 1]} : vector<24x1536xf32> to vector<8x1536xf32>
    %143 = arith.mulf %141, %142 : vector<8x1536xf32>
    %144 = arith.addf %139, %143 : vector<8x1536xf32>
    %cst_81 = arith.constant dense<0.000000e+00> : vector<1536xf32>
    %145 = vector.multi_reduction <add>, %144, %cst_81 [0] : vector<8x1536xf32> to vector<1536xf32>
    %146 = vector.shape_cast %145 : vector<1536xf32> to vector<1x1536xf32>
    %147 = tpu.iota {dimensions = array<i32: 1>} : vector<1x2xi32>
    %cst_82 = arith.constant 0.000000e+00 : f32
    %148 = vector.broadcast %cst_82 : f32 to vector<1x2xf32>
    %149 = vector.extract_strided_slice %146 {offsets = [0, 0], sizes = [1, 768], strides = [1, 1]} : vector<1x1536xf32> to vector<1x768xf32>
    %cst_83 = arith.constant dense<0.000000e+00> : vector<1xf32>
    %150 = vector.multi_reduction <add>, %149, %cst_83 [1] : vector<1x768xf32> to vector<1xf32>
    %151 = vector.shape_cast %150 : vector<1xf32> to vector<1x1xf32>
    %c0_i32 = arith.constant 0 : i32
    %152 = vector.broadcast %c0_i32 : i32 to vector<1x2xi32>
    %153 = arith.cmpi eq, %147, %152 : vector<1x2xi32>
    %cst_84 = arith.constant 0.000000e+00 : f32
    %154 = vector.shape_cast %151 : vector<1x1xf32> to vector<1x1xf32>
    %155 = vector.broadcast %154 : vector<1x1xf32> to vector<1x2xf32>
    %156 = vector.broadcast %cst_84 : f32 to vector<1x2xf32>
    %157 = arith.select %153, %155, %156 : vector<1x2xi1>, vector<1x2xf32>
    %158 = arith.addf %148, %157 : vector<1x2xf32>
    %159 = vector.extract_strided_slice %146 {offsets = [0, 768], sizes = [1, 768], strides = [1, 1]} : vector<1x1536xf32> to vector<1x768xf32>
    %cst_85 = arith.constant dense<0.000000e+00> : vector<1xf32>
    %160 = vector.multi_reduction <add>, %159, %cst_85 [1] : vector<1x768xf32> to vector<1xf32>
    %161 = vector.shape_cast %160 : vector<1xf32> to vector<1x1xf32>
    %c1_i32 = arith.constant 1 : i32
    %162 = vector.broadcast %c1_i32 : i32 to vector<1x2xi32>
    %163 = arith.cmpi eq, %147, %162 : vector<1x2xi32>
    %cst_86 = arith.constant 0.000000e+00 : f32
    %164 = vector.shape_cast %161 : vector<1x1xf32> to vector<1x1xf32>
    %165 = vector.broadcast %164 : vector<1x1xf32> to vector<1x2xf32>
    %166 = vector.broadcast %cst_86 : f32 to vector<1x2xf32>
    %167 = arith.select %163, %165, %166 : vector<1x2xi1>, vector<1x2xf32>
    %168 = arith.addf %158, %167 : vector<1x2xf32>
    %c208 = arith.constant 208 : index
    %c0_87 = arith.constant 0 : index
    %169 = vector.load %arg1[%c208, %c0_87] : memref<216x8xf32, #tpu.memory_space<vmem>>, vector<1x1xf32>
    %170 = vector.broadcast %169 : vector<1x1xf32> to vector<1x2xf32>
    %171 = arith.addf %168, %170 : vector<1x2xf32>
    %c0_88 = arith.constant 0 : index
    %c0_89 = arith.constant 0 : index
    %172 = vector.load %arg2[%c0_88, %c0_89] : memref<1x2xf32, #tpu.memory_space<vmem>>, vector<1x2xf32>
    tpu.vector_store %arg2[%c0_88, %c0_89], %171 {strides = array<i32>} : memref<1x2xf32, #tpu.memory_space<vmem>>, vector<1x2xf32>,
    return
  }
}

</mosaic_0001>

<bundles_post_ra>
// kernel: deepspectra_forward.1
= control target key start
LH: loop header
LB: loop body
LE: loop exit
PB: predicated region body
PF: predicated region fallthrough
CT: control target
= control target key end

     0   :  { %vm201_vm0 = vcmask 1043456   ;;  %v7216_v7 = vmov 0   ;;  %vm191_vm1 = vcmask 64512   ;;  %s7213_s0 = inlined_call_operand.vmem [shape: f32[32,1536], index: 0, kind: input, shape index: {}]   ;;  %s7214_s1 = inlined_call_operand.vmem [shape: f32[216,8], index: 1, kind: input, shape index: {}]   ;;  %s7215_s2 = inlined_call_operand.hbm [shape: f32[1,2], index: 2, kind: output, shape index: {}]  }
   0x1   :  { %v87_v0 = vld [vmem:[%s7213_s0 + $0x8] sm:$0xff]  ;;  %v89_v1 = vld [vmem:[%s7213_s0 + $0x18] sm:$0xff]  ;;  %v86_v2 = vld [vmem:[%s7213_s0] sm:$0xff]  ;;  %270 = vmatprep.mubr.bf16.mxu0 %v7216_v7  ;;  %333 = vmatprep.mubr.bf16.mxu1 %v7216_v7 }
   0x2   :  { %v144_v3 = vpack.c.bf16 %v87_v0, %v87_v0  ;;  %v146_v4 = vpack.c.bf16 %v89_v1, %v89_v1  ;;  %v143_v5 = vpack.c.bf16 %v86_v2, %v86_v2  ;;  %v88_v6 = vld [vmem:[%s7213_s0 + $0x10] sm:$0xff]  ;;  %v134_v8 = vld [vmem:[%s7214_s1] sm:$0xff]  ;;  %v135_v9 = vld [vmem:[%s7214_s1 + $0x8] sm:$0xff]  ;;  %5474 = vset.pattern.permute.xlu0 %v7216_v7  ;;  %5475 = vset.pattern.permute.xlu1 %v7216_v7 }
   0x3   :  { %v145_v10 = vpack.c.bf16 %v88_v6, %v88_v6  ;;  %v91_v11 = vld [vmem:[%s7213_s0 + $0x28] sm:$0xff]  ;;  %v90_v12 = vld [vmem:[%s7213_s0 + $0x20] sm:$0xff]  ;;  %v5644_v14 = vpack.c.bf16 %v135_v9, %v134_v8  ;;  %v93_v17 = vld [vmem:[%s7213_s0 + $0x38] sm:$0xff] }
   0x4   :  { %5082 = vmatprep.subr.msk.bf16.mxu0 %vm201_vm0, %v144_v3  ;;  %5086 = vmatprep.subr.msk.bf16.mxu1 %vm201_vm0, %v146_v4  ;;  %v203_v13 = vsel %vm201_vm0, %v143_v5, 0  ;;  %v148_v15 = vpack.c.bf16 %v91_v11, %v91_v11  ;;  %v147_v16 = vpack.c.bf16 %v90_v12, %v90_v12  ;;  %v92_v18 = vld [vmem:[%s7213_s0 + $0x30] sm:$0xff]  ;;  %v150_v20 = vpack.c.bf16 %v93_v17, %v93_v17  ;;  %v95_v22 = vld [vmem:[%s7213_s0 + $0x48] sm:$0xff]  ;;  %v97_v24 = vld [vmem:[%s7213_s0 + $0x58] sm:$0xff] }
   0x5   :  { %239 = vmatpush1.bf16.msra.mxu0 %v203_v13  ;;  %v209_v19 = vsel %vm201_vm0, %v145_v10, 0  ;;  %v149_v21 = vpack.c.bf16 %v92_v18, %v92_v18  ;;  %v152_v25 = vpack.c.bf16 %v95_v22, %v95_v22  ;;  %v155_v26 = vld [vmem:[%s7214_s1 + $0x88] sm:$0xff]  ;;  %v154_v28 = vpack.c.bf16 %v97_v24, %v97_v24 }
   0x6   :  { %302 = vmatpush1.bf16.msra.mxu1 %v209_v19  ;;  %5090 = vmatprep.subr.msk.bf16.mxu0 %vm201_vm0, %v148_v15  ;;  %v215_v23 = vsel %vm201_vm0, %v147_v16, 0 }
   0x7   :  { %5094 = vmatprep.subr.msk.bf16.mxu1 %vm201_vm0, %v150_v20  ;;  %v221_v27 = vsel %vm201_vm0, %v149_v21, 0  ;;  %163 = vperm.xlu0 %5474, %v155_v26  }
   0x8   :  { %5083 = vmatmul.mubr.msk.bf16.vlgmr.msra.gmra.mrb[0].mxu0 %vm191_vm1, %v5644_v14 }
   0x9   :  { %7 = vsyncpa [#allocation4], 0  ;;  %5087 = vmatmul.mubr.msk.bf16.vlgmr.msra.gmra.mrb[0].mxu1 %vm191_vm1, %v5644_v14  ;;  %365 = vmatpush1.bf16.msra.mxu0 %v215_v23  ;;  %v136_v29 = vld [vmem:[%s7214_s1 + $0x10] sm:$0xff]  ;;  %v137_v30 = vld [vmem:[%s7214_s1 + $0x18] sm:$0xff]  ;;  %v7218_v33 = vmov 0.0|0.0   ;;  %s5592_s13 = smov 1   ;;  %v13_v5 = vlaneseq }
   0xa   :  { %v156_v31 = vld [vmem:[%s7214_s1 + $0x90] sm:$0xff]  ;;  %280 = vmatprep.mubr.bf16.mxu0 %v7216_v7  ;;  %343 = vmatprep.mubr.bf16.mxu1 %v7216_v7  ;;  %v141_v32 = vpack.c.bf16 %v137_v30, %v136_v29  ;;  %v138_v35 = vld [vmem:[%s7214_s1 + $0x20] sm:$0xff]  ;;  %v139_v36 = vld [vmem:[%s7214_s1 + $0x28] sm:$0xff]  ;;  %s5593_s24 = smov 127   ;;  %s5594_s25 = smov 126   ;;  %vm746_vm4 = vcmask 7168  }
   0xb   :  { %428 = vmatpush1.bf16.msra.mxu1 %v221_v27  ;;  %5098 = vmatprep.subr.msk.bf16.mxu0 %vm201_vm0, %v152_v25  ;;  %v160_v34 = vld [vmem:[%s7214_s1 + $0xb0] sm:$0xff]  ;;  %v142_v37 = vpack.c.bf16 %v139_v36, %v138_v35  ;;  %v94_v38 = vld [vmem:[%s7213_s0 + $0x40] sm:$0xff]  ;;  %s5595_s26 = smov 2   ;;  %vm1439_vm5 = vcmask 1039360   ;;  %vm3198_vm6 = vcmask 1031168   ;;  %vm1831_vm7 = vcmask 15360  }
   0xc   :  { %5102 = vmatprep.subr.msk.bf16.mxu1 %vm201_vm0, %v154_v28  ;;  %168 = vperm.xlu1 %5475, %v156_v31   ;;  %v96_v39 = vld [vmem:[%s7213_s0 + $0x50] sm:$0xff]  ;;  %v151_v40 = vpack.c.bf16 %v94_v38, %v94_v38  ;;  %s5597_s22 = smov [#allocation3]   ;;  %vm5066_vm10 = vcmask 8192  }
   0xd   :  { %720 = vrot.lane.b32.xlu0 %v7218_v33, %s5592_s13  ;;  %v153_v41 = vpack.c.bf16 %v96_v39, %v96_v39  ;;  %s5074_s23 = sshll.u32 %s5597_s22, 4  ;;  %s5075_s23 = int_to_ptr.vmem [resolvable:$true] %s5074_s23 }
   0xe   :  { %v227_v42 = vsel %vm201_vm0, %v151_v40, 0  ;;  %p5571_p1 = scmp.lt.s32.totalorder %s5075_s23, %s5075_s23 }
   0xf   :  { %v233_v43 = vsel %vm201_vm0, %v153_v41, 0 }
  0x10   :  { %5084 = vmatmul.mubr.msk.bf16.gmra.mrb[4].mxu0 %vm191_vm1, %v141_v32 }
  0x11   :  { %5088 = vmatmul.mubr.msk.bf16.gmra.mrb[4].mxu1 %vm191_vm1, %v141_v32  ;;  %290 = vmatprep.mubr.bf16.mxu0 %v7216_v7 }
  0x12   :  { %353 = vmatprep.mubr.bf16.mxu1 %v7216_v7  ;;  %188 = vperm.xlu0 %5474, %v160_v34  }
  0x18   :  { %5085 = vmatmul.mubr.msk.bf16.gmra.mrb[8].mxu0 %vm191_vm1, %v142_v37 }
  0x19   :  { %5089 = vmatmul.mubr.msk.bf16.gmra.mrb[8].mxu1 %vm191_vm1, %v142_v37  ;;  %396 = vmatprep.mubr.bf16.mxu0 %v7216_v7 }
  0x1a   :  { %459 = vmatprep.mubr.bf16.mxu1 %v7216_v7 }
  0x20   :  { %5091 = vmatmul.mubr.msk.bf16.vlgmr.msra.gmra.mrb[12].mxu0 %vm191_vm1, %v5644_v14 }
  0x21   :  { %5095 = vmatmul.mubr.msk.bf16.vlgmr.msra.gmra.mrb[12].mxu1 %vm191_vm1, %v5644_v14  ;;  %491 = vmatpush1.bf16.msra.mxu0 %v227_v42 }
  0x22   :  { %406 = vmatprep.mubr.bf16.mxu0 %v7216_v7  ;;  %469 = vmatprep.mubr.bf16.mxu1 %v7216_v7 }
  0x23   :  { %554 = vmatpush1.bf16.msra.mxu1 %v233_v43 }
  0x28   :  { %5092 = vmatmul.mubr.msk.bf16.gmra.mrb[16].mxu0 %vm191_vm1, %v141_v32 }
  0x29   :  { %5096 = vmatmul.mubr.msk.bf16.gmra.mrb[16].mxu1 %vm191_vm1, %v141_v32  ;;  %416 = vmatprep.mubr.bf16.mxu0 %v7216_v7 }
  0x2a   :  { %479 = vmatprep.mubr.bf16.mxu1 %v7216_v7 }
  0x30   :  { %5093 = vmatmul.mubr.msk.bf16.gmra.mrb[20].mxu0 %vm191_vm1, %v142_v37 }
  0x31   :  { %5097 = vmatmul.mubr.msk.bf16.gmra.mrb[20].mxu1 %vm191_vm1, %v142_v37  ;;  %522 = vmatprep.mubr.bf16.mxu0 %v7216_v7 }
  0x32   :  { %585 = vmatprep.mubr.bf16.mxu1 %v7216_v7 }
  0x38   :  { %5099 = vmatmul.mubr.msk.bf16.vlgmr.msra.gmra.mrb[24].mxu0 %vm191_vm1, %v5644_v14 }
  0x39   :  { %5103 = vmatmul.mubr.msk.bf16.vlgmr.msra.gmra.mrb[24].mxu1 %vm191_vm1, %v5644_v14  ;;  %532 = vmatprep.mubr.bf16.mxu0 %v7216_v7  ;;  %v5804_v14 = vand.u32 127, %v13_v5 }
  0x3a   :  { %595 = vmatprep.mubr.bf16.mxu1 %v7216_v7 }
  0x3b   :  { %7230 = vst [vmem:[#allocation14_spill] sm:$0xff] %v5804_v14  ;;  %v5809_v16 = vadd.s32 640, %v5804_v14 }
  0x3d   :  { %vm31_vm2 = vcmp.lt.s32.totalorder %v5809_v16, 689 }
  0x40   :  { %5100 = vmatmul.mubr.msk.bf16.gmra.mrb[28].mxu0 %vm191_vm1, %v141_v32 }
  0x41   :  { %5104 = vmatmul.mubr.msk.bf16.gmra.mrb[28].mxu1 %vm191_vm1, %v141_v32  ;;  %542 = vmatprep.mubr.bf16.mxu0 %v7216_v7 }
  0x42   :  { %605 = vmatprep.mubr.bf16.mxu1 %v7216_v7 }
  0x48   :  { %5101 = vmatmul.mubr.msk.bf16.gmra.mrb[32].mxu0 %vm191_vm1, %v142_v37 }
  0x49   :  { %5105 = vmatmul.mubr.msk.bf16.gmra.mrb[32].mxu1 %vm191_vm1, %v142_v37  ;;  %830 = vmatprep.mubr.bf16.mxu0 %v7216_v7 }
  0x4a   :  { %871 = vmatprep.mubr.bf16.mxu1 %v7216_v7 }
  0x86   :  { %v5738_v44 = vpop.permute.xlu0 %163 }
  0xdb   :  { %v272_v45 = vpop.f32.mrb[0].mxu0 }
  0xdc   :  { %v273_v46 = vadd.f32 %v272_v45, %v5738_v44  ;;  %v335_v47 = vpop.f32.mrb[0].mxu1  ;;  %v274_v48 = vpop.f32.mrb[1].mxu0 }
  0xdd   :  { %v336_v49 = vadd.f32 %v335_v47, %v5738_v44  ;;  %v5742_v50 = vpop.f32.mrb[2].mxu0  ;;  %v337_v51 = vpop.f32.mrb[1].mxu1  ;;  %v275_v53 = vadd.f32 %v274_v48, %v5738_v44 }
  0xde   :  { %v5744_v52 = vpack.c.bf16 %v273_v46, %v273_v46  ;;  %v5747_v54 = vpop.f32.mrb[3].mxu0  ;;  %v5749_v55 = vpop.f32.mrb[2].mxu1  ;;  %v338_v59 = vadd.f32 %v337_v51, %v5738_v44 }
  0xdf   :  { %v5751_v56 = vpack.c.bf16 %v336_v49, %v336_v49  ;;  %v5753_v57 = vpop.f32.mrb[3].mxu1  ;;  %v5759_v58 = vpack.c.bf16 %v275_v53, %v275_v53 }
  0xe0   :  { %722 = vrot.lane.b32.xlu1 %v5744_v52, %s5592_s13  ;;  %v5776_v1 = vpack.c.bf16 %v338_v59, %v338_v59  ;;  %v5875_v59 = vadd.s32 1408, %v5804_v14 }
  0xe1   :  { %726 = vrot.lane.b32.xlu0 %v5751_v56, %s5592_s13 }
  0xe2   :  { %vm61_vm3 = vcmp.lt.s32.totalorder %v5875_v59, 1457 }
  0xe3   :  { %v5762_v60 = vpop.f32.mrb[4].mxu0 }
  0xe4   :  { %v5764_v61 = vpop.f32.mrb[5].mxu0  ;;  %v5766_v62 = vpop.f32.mrb[4].mxu1  ;;  %724 = vrot.lane.b32.xlu1 %v5759_v58, %s5592_s13 }
  0xe5   :  { %1413 = vrot.lane.b32.xlu0 %v5744_v52, %s5593_s24  ;;  %v5772_v63 = vpop.f32.mrb[6].mxu0  ;;  %v5774_v0 = vpop.f32.mrb[5].mxu1 }
  0xe6   :  { %7222 = vst [vmem:[#allocation6_spill] sm:$0xff] %v5772_v63  ;;  %v5778_v2 = vpop.f32.mrb[7].mxu0  ;;  %v5780_v3 = vpop.f32.mrb[6].mxu1 }
  0xe7   :  { %7223 = vst [vmem:[#allocation7_spill] sm:$0xff] %v5778_v2  ;;  %7224 = vst [vmem:[#allocation8_spill] sm:$0xff] %v5780_v3  ;;  %v5782_v4 = vpop.f32.mrb[7].mxu1 }
  0xe8   :  { %7225 = vst [vmem:[#allocation9_spill] sm:$0xff] %v5782_v4  ;;  %728 = vrot.lane.b32.xlu1 %v5776_v1, %s5592_s13 }
  0xe9   :  { %1417 = vrot.lane.b32.xlu0 %v5751_v56, %s5593_s24 }
  0xeb   :  { %v5788_v6 = vpop.f32.mrb[8].mxu0 }
  0xec   :  { %7226 = vst [vmem:[#allocation10_spill] sm:$0xff] %v5788_v6  ;;  %v5790_v8 = vpop.f32.mrb[9].mxu0  ;;  %v5792_v9 = vpop.f32.mrb[8].mxu1  ;;  %1415 = vrot.lane.b32.xlu1 %v5759_v58, %s5593_s24 }
  0xed   :  { %7227 = vst [vmem:[#allocation11_spill] sm:$0xff] %v5790_v8  ;;  %7228 = vst [vmem:[#allocation12_spill] sm:$0xff] %v5792_v9  ;;  %v5796_v10 = vpop.f32.mrb[10].mxu0  ;;  %v5798_v11 = vpop.f32.mrb[9].mxu1 }
  0xee   :  { %7229 = vst [vmem:[#allocation13_spill] sm:$0xff] %v5798_v11  ;;  %v5800_v12 = vpop.f32.mrb[11].mxu0  ;;  %v5802_v13 = vpop.f32.mrb[10].mxu1 }
  0xef   :  { %v5806_v15 = vpop.f32.mrb[11].mxu1 }
  0xf3   :  { %v398_v17 = vpop.f32.mrb[12].mxu0 }
  0xf4   :  { %v399_v18 = vadd.f32 %v398_v17, %v5738_v44  ;;  %v461_v19 = vpop.f32.mrb[12].mxu1  ;;  %v400_v20 = vpop.f32.mrb[13].mxu0 }
  0xf5   :  { %v401_v21 = vadd.f32 %v400_v20, %v5738_v44  ;;  %v463_v22 = vpop.f32.mrb[13].mxu1  ;;  %v5813_v23 = vpop.f32.mrb[14].mxu0  ;;  %v462_v25 = vadd.f32 %v461_v19, %v5738_v44 }
  0xf6   :  { %v5815_v24 = vpack.c.bf16 %v399_v18, %v399_v18  ;;  %v464_v26 = vadd.f32 %v463_v22, %v5738_v44  ;;  %v5820_v27 = vpop.f32.mrb[15].mxu0  ;;  %v5822_v28 = vpop.f32.mrb[14].mxu1 }
  0xf7   :  { %v5824_v29 = vpop.f32.mrb[15].mxu1  ;;  %v645_v31 = vsel %vm31_vm2, %v401_v21, 0.0  ;;  %v5832_v32 = vpack.c.bf16 %v462_v25, %v462_v25 }
  0xf8   :  { %v5826_v30 = vpack.c.bf16 %v464_v26, %v464_v26  ;;  %730 = vrot.lane.b32.xlu0 %v5815_v24, %s5592_s13  ;;  %v5838_v35 = vpack.c.bf16 %v645_v31, %v645_v31 }
  0xfa   :  { %736 = vrot.lane.b32.xlu1 %v5826_v30, %s5592_s13 }
  0xfb   :  { %v5836_v34 = vpop.f32.mrb[16].mxu0 }
  0xfc   :  { %v5840_v36 = vpop.f32.mrb[17].mxu0  ;;  %v5842_v37 = vpop.f32.mrb[16].mxu1  ;;  %734 = vrot.lane.b32.xlu0 %v5832_v32, %s5592_s13 }
  0xfd   :  { %v5846_v38 = vpop.f32.mrb[18].mxu0  ;;  %v5848_v39 = vpop.f32.mrb[17].mxu1 }
  0xfe   :  { %7231 = vst [vmem:[#allocation15_spill] sm:$0xff] %v5846_v38  ;;  %732 = vrot.lane.b32.xlu1 %v5838_v35, %s5592_s13  ;;  %v5852_v40 = vpop.f32.mrb[19].mxu0  ;;  %v5854_v41 = vpop.f32.mrb[18].mxu1 }
  0xff   :  { %7232 = vst [vmem:[#allocation16_spill] sm:$0xff] %v5852_v40  ;;  %7233 = vst [vmem:[#allocation17_spill] sm:$0xff] %v5854_v41  ;;  %v5856_v42 = vpop.f32.mrb[19].mxu1 }
 0x100   :  { %7234 = vst [vmem:[#allocation18_spill] sm:$0xff] %v5856_v42  ;;  %v7251_v42 = vmov 0.0|0.0  }
 0x102   :  { %1419 = vrot.lane.b32.xlu1 %v5776_v1, %s5593_s24 }
 0x103   :  { %v5860_v43 = vpop.f32.mrb[20].mxu0 }
 0x104   :  { %7235 = vst [vmem:[#allocation19_spill] sm:$0xff] %v5860_v43  ;;  %v5862_v45 = vpop.f32.mrb[20].mxu1  ;;  %v5864_v46 = vpop.f32.mrb[21].mxu0 }
 0x105   :  { %7236 = vst [vmem:[#allocation20_spill] sm:$0xff] %v5862_v45  ;;  %7237 = vst [vmem:[#allocation21_spill] sm:$0xff] %v5864_v46  ;;  %v5866_v47 = vpop.f32.mrb[21].mxu1  ;;  %v5868_v48 = vpop.f32.mrb[22].mxu0 }
 0x106   :  { %7238 = vst [vmem:[#allocation22_spill] sm:$0xff] %v5866_v47  ;;  %v5870_v49 = vpop.f32.mrb[22].mxu1  ;;  %v424_v51 = vpop.f32.mrb[23].mxu0 }
 0x107   :  { %v5872_v53 = vpop.f32.mrb[23].mxu1 }
 0x10b   :  { %v524_v5 = vpop.f32.mrb[24].mxu0 }
 0x10c   :  { %v525_v17 = vadd.f32 %v524_v5, %v5738_v44  ;;  %v587_v18 = vpop.f32.mrb[24].mxu1  ;;  %v526_v19 = vpop.f32.mrb[25].mxu0 }
 0x10d   :  { %v527_v20 = vadd.f32 %v526_v19, %v5738_v44  ;;  %v589_v21 = vpop.f32.mrb[25].mxu1  ;;  %v5880_v22 = vpop.f32.mrb[26].mxu0  ;;  %v588_v26 = vadd.f32 %v587_v18, %v5738_v44 }
 0x10e   :  { %v5882_v25 = vpack.c.bf16 %v525_v17, %v525_v17  ;;  %v590_v31 = vadd.f32 %v589_v21, %v5738_v44  ;;  %v5886_v7 = vpop.f32.mrb[27].mxu0  ;;  %v5888_v33 = vpop.f32.mrb[26].mxu1 }
 0x10f   :  { %v5890_v5 = vpack.c.bf16 %v527_v20, %v527_v20  ;;  %v5892_v14 = vpop.f32.mrb[27].mxu1  ;;  %v5900_v17 = vpack.c.bf16 %v588_v26, %v588_v26  ;;  %v5902_v44 = vpop.permute.xlu0 %720 }
 0x110   :  { %v651_v19 = vsel %vm61_vm3, %v590_v31, 0.0  ;;  %738 = vrot.lane.b32.xlu0 %v5882_v25, %s5592_s13 }
 0x111   :  { %740 = vrot.lane.b32.xlu1 %v5890_v5, %s5592_s13  ;;  %v5904_v18 = vpack.c.bf16 %v651_v19, %v651_v19 }
 0x113   :  { %v5906_v21 = vpop.f32.mrb[28].mxu0  ;;  %v5930_v43 = vpop.permute.xlu0 %188 }
 0x114   :  { %7239 = vst [vmem:[#allocation23_spill] sm:$0xff] %v5906_v21  ;;  %742 = vrot.lane.b32.xlu0 %v5900_v17, %s5592_s13  ;;  %v5910_v20 = vpop.f32.mrb[28].mxu1  ;;  %v5912_v31 = vpop.f32.mrb[29].mxu0 }
 0x115   :  { %7240 = vst [vmem:[#allocation24_spill] sm:$0xff] %v5910_v20  ;;  %7241 = vst [vmem:[#allocation25_spill] sm:$0xff] %v5912_v31  ;;  %744 = vrot.lane.b32.xlu1 %v5904_v18, %s5592_s13  ;;  %v5916_v47 = vpop.f32.mrb[29].mxu1  ;;  %v5918_v26 = vpop.f32.mrb[30].mxu0 }
 0x116   :  { %7242 = vst [vmem:[#allocation26_spill] sm:$0xff] %v5916_v47  ;;  %7243 = vst [vmem:[#allocation27_spill] sm:$0xff] %v5918_v26  ;;  %v5920_v45 = vpop.f32.mrb[30].mxu1  ;;  %v5922_v19 = vpop.f32.mrb[31].mxu0 }
 0x117   :  { %7244 = vst [vmem:[#allocation28_spill] sm:$0xff] %v5920_v45  ;;  %7245 = vst [vmem:[#allocation29_spill] sm:$0xff] %v5922_v19  ;;  %v5924_v46 = vpop.f32.mrb[31].mxu1  ;;  %v5973_v26 = vpop.permute.xlu1 %168 }
 0x118   :  { %7246 = vst [vmem:[#allocation30_spill] sm:$0xff] %v5924_v46  ;;  %1421 = vrot.lane.b32.xlu0 %v5815_v24, %s5593_s24  ;;  %v279_v40 = vadd.f32 %v5747_v54, %v5973_v26  ;;  %v5997_v54 = vadd.f32 %v5868_v48, %v5930_v43  ;;  %v6016_v48 = vadd.f32 %v5872_v53, %v5930_v43 }
 0x119   :  { %1423 = vrot.lane.b32.xlu1 %v5838_v35, %s5593_s24 }
 0x11a   :  { %v5988_v38 = vpack.c.bf16 %v279_v40, %v279_v40 }
 0x11b   :  { %v5932_v11 = vpop.f32.mrb[32].mxu0 }
 0x11c   :  { %7247 = vst [vmem:[#allocation31_spill] sm:$0xff] %v5932_v11  ;;  %v5934_v9 = vpop.f32.mrb[32].mxu1  ;;  %v5936_v8 = vpop.f32.mrb[33].mxu0  ;;  %1425 = vrot.lane.b32.xlu0 %v5832_v32, %s5593_s24  ;;  %v5950_v11 = vadd.f32 %v5796_v10, %v5930_v43  ;;  %v5967_v10 = vadd.f32 %v5802_v13, %v5930_v43  ;;  %v425_v13 = vadd.f32 %v424_v51, %v5930_v43 }
 0x11d   :  { %7248 = vst [vmem:[#allocation32_spill] sm:$0xff] %v5934_v9  ;;  %7249 = vst [vmem:[#allocation33_spill] sm:$0xff] %v5936_v8  ;;  %v5940_v6 = vpop.f32.mrb[33].mxu1  ;;  %v5942_v46 = vpop.f32.mrb[34].mxu0  ;;  %1427 = vrot.lane.b32.xlu1 %v5826_v30, %s5593_s24  ;;  %v5954_v9 = vadd.f32 %v5800_v12, %v5930_v43  ;;  %v5971_v12 = vadd.f32 %v5806_v15, %v5930_v43  ;;  %v277_v15 = vadd.f32 %v5742_v50, %v5973_v26 }
 0x11e   :  { %7250 = vst [vmem:[#allocation34_spill] sm:$0xff] %v5940_v6  ;;  %v5946_v45 = vpop.f32.mrb[34].mxu1  ;;  %v550_v19 = vpop.f32.mrb[35].mxu0  ;;  %v340_v50 = vadd.f32 %v5749_v55, %v5973_v26  ;;  %v405_v55 = vadd.f32 %v5820_v27, %v5973_v26  ;;  %v403_v27 = vadd.f32 %v5813_v23, %v5973_v26 }
 0x11f   :  { %v613_v8 = vpop.f32.mrb[35].mxu1  ;;  %v5476_v6 = vpack.i.bf16 %v5954_v9, %v5950_v11  ;;  %v5481_v41 = vpack.i.bf16 %v5971_v12, %v5967_v10  ;;  %v6001_v51 = vpack.c.bf16 %v277_v15, %v277_v15  ;;  %v342_v15 = vadd.f32 %v5753_v57, %v5973_v26 }
 0x120   :  { %1429 = vrot.lane.b32.xlu0 %v5882_v25, %s5593_s24  ;;  %v657_v53 = vsel %vm31_vm2, %v405_v55, 0.0  ;;  %v6043_v57 = vpack.c.bf16 %v403_v27, %v403_v27  ;;  %v466_v55 = vadd.f32 %v5822_v28, %v5973_v26  ;;  %v531_v27 = vadd.f32 %v5886_v7, %v5973_v26 }
 0x121   :  { %1431 = vrot.lane.b32.xlu1 %v5890_v5, %s5593_s24 }
 0x122   :  { %v6053_v23 = vpack.c.bf16 %v466_v55, %v466_v55  ;;  %v6072_v55 = vadd.f32 %v550_v19, %v5930_v43  ;;  %v6089_v19 = vadd.f32 %v5946_v45, %v5930_v43 }
 0x124   :  { %1433 = vrot.lane.b32.xlu0 %v5900_v17, %s5593_s24 }
 0x125   :  { %5477 = vrot.lane.b32.xlu1 %v5476_v6, %s5593_s24 }
 0x128   :  { %1437 = vrot.lane.b32.xlu0 %v7251_v42, %s5593_s24 }
 0x129   :  { %5487 = vrot.lane.b32.xlu1 %v5476_v6, %s5594_s25  ;;  %v5992_v6 = vsel %vm31_vm2, %v425_v13, -inf  ;;  %v6018_v13 = vpack.c.bf16 %v340_v50, %v340_v50  ;;  %v6033_v50 = vpack.c.bf16 %v342_v15, %v342_v15  ;;  %v468_v15 = vadd.f32 %v5824_v29, %v5973_v26 }
 0x12a   :  { %v5501_v40 = vpack.i.bf16 %v5992_v6, %v5997_v54  ;;  %v6069_v29 = vadd.f32 %v5942_v46, %v5930_v43 }
 0x12c   :  { %5482 = vrot.lane.b32.xlu0 %v5481_v41, %s5593_s24  ;;  %v5516_v7 = vpack.i.bf16 %v6072_v55, %v6069_v29 }
 0x12d   :  { %1805 = vrot.lane.b32.xlu1 %v7251_v42, %s5595_s26 }
 0x130   :  { %5492 = vrot.lane.b32.xlu0 %v5481_v41, %s5594_s25  ;;  %v6012_v41 = vadd.f32 %v5870_v49, %v5930_v43 }
 0x131   :  { %1809 = vrot.lane.b32.xlu1 %v5988_v38, %s5595_s26 }
 0x132   :  { %v5506_v49 = vpack.i.bf16 %v6016_v48, %v6012_v41 }
 0x134   :  { %1807 = vrot.lane.b32.xlu0 %v6001_v51, %s5595_s26 }
 0x135   :  { %5502 = vrot.lane.b32.xlu1 %v5501_v40, %s5594_s25 }
 0x138   :  { %5497 = vrot.lane.b32.xlu0 %v5501_v40, %s5593_s24  ;;  %v6037_v40 = vpack.c.bf16 %v657_v53, %v657_v53  ;;  %v6057_v53 = vpack.c.bf16 %v468_v15, %v468_v15  ;;  %v614_v15 = vadd.f32 %v613_v8, %v5930_v43 }
 0x139   :  { %1811 = vrot.lane.b32.xlu1 %v6018_v13, %s5595_s26 }
 0x13a   :  { %v6085_v46 = vsel %vm61_vm3, %v614_v15, -inf  ;;  %v594_v15 = vadd.f32 %v5892_v14, %v5973_v26 }
 0x13c   :  { %5507 = vrot.lane.b32.xlu0 %v5506_v49, %s5593_s24  ;;  %v663_v4 = vsel %vm61_vm3, %v594_v15, 0.0 }
 0x13d   :  { %5512 = vrot.lane.b32.xlu1 %v5506_v49, %s5594_s25  ;;  %v529_v49 = vadd.f32 %v5880_v22, %v5973_v26  ;;  %v6074_v22 = vpack.c.bf16 %v531_v27, %v531_v27  ;;  %v592_v27 = vadd.f32 %v5888_v33, %v5973_v26  ;;  %v679_v33 = vld [vmem:[%s7214_s1 + $0x30] sm:$0xff]  ;;  %v5596_v26 = vmov -inf  }
 0x13e   :  { %v6119_v15 = vpack.c.bf16 %v679_v33, %v679_v33 }
 0x13f   :  { %v6065_v28 = vpack.c.bf16 %v529_v49, %v529_v49  ;;  %v5526_v49 = vpack.i.bf16 %v6085_v46, %v6089_v19 }
 0x140   :  { %1813 = vrot.lane.b32.xlu0 %v6033_v50, %s5595_s26 }
 0x141   :  { %1817 = vrot.lane.b32.xlu1 %v6037_v40, %s5595_s26 }
 0x144   :  { %1815 = vrot.lane.b32.xlu0 %v6043_v57, %s5595_s26 }
 0x145   :  { %1435 = vrot.lane.b32.xlu1 %v5904_v18, %s5593_s24 }
 0x148   :  { %1819 = vrot.lane.b32.xlu0 %v6053_v23, %s5595_s26 }
 0x149   :  { %1821 = vrot.lane.b32.xlu1 %v6057_v53, %s5595_s26 }
 0x14c   :  { %1823 = vrot.lane.b32.xlu0 %v6065_v28, %s5595_s26 }
 0x14d   :  { %1825 = vrot.lane.b32.xlu1 %v6074_v22, %s5595_s26 }
 0x150   :  { %5517 = vrot.lane.b32.xlu0 %v5516_v7, %s5593_s24 }
 0x151   :  { %5522 = vrot.lane.b32.xlu1 %v5516_v7, %s5594_s25  ;;  %v6103_v7 = vpack.c.bf16 %v592_v27, %v592_v27  ;;  %v6117_v27 = vpack.c.bf16 %v663_v4, %v663_v4  ;;  %v7252_v4 = vmov 0  }
 0x152   :  { %v723_v8 = vpop.permute.xlu1 %722 }
 0x153   :  { %v747_v43 = vsel %vm746_vm4, %v5902_v44, %v723_v8  ;;  %v727_v14 = vpop.permute.xlu0 %726 }
 0x154   :  { %5527 = vrot.lane.b32.xlu0 %v5526_v49, %s5593_s24  ;;  %v763_v44 = vsel %vm201_vm0, %v747_v43, 0 }
 0x155   :  { %5532 = vrot.lane.b32.xlu1 %v5526_v49, %s5594_s25 }
 0x156   :  { %v725_v45 = vpop.permute.xlu1 %724 }
 0x157   :  { %v748_v3 = vsel %vm746_vm4, %v723_v8, %v725_v45  ;;  %v749_v49 = vsel %vm746_vm4, %v725_v45, %v727_v14  ;;  %v6131_v43 = vpop.permute.xlu0 %1413 }
 0x158   :  { %5106 = vmatprep.subr.msk.bf16.mxu0 %vm201_vm0, %v748_v3  ;;  %3671 = vrot.lane.b32.xlu0 %v5596_v26, %s5594_s25  ;;  %v769_v3 = vsel %vm201_vm0, %v749_v49, 0 }
 0x159   :  { %799 = vmatpush1.bf16.msra.mxu0 %v763_v44  ;;  %1827 = vrot.lane.b32.xlu1 %v6103_v7, %s5595_s26 }
 0x15a   :  { %v729_v8 = vpop.permute.xlu1 %728 }
 0x15b   :  { %v750_v2 = vsel %vm746_vm4, %v727_v14, %v729_v8 }
 0x15c   :  { %5108 = vmatprep.subr.msk.bf16.mxu1 %vm201_vm0, %v750_v2  ;;  %1829 = vrot.lane.b32.xlu0 %v6117_v27, %s5595_s26  ;;  %v6144_v2 = vpop.permute.xlu0 %1417 }
 0x15d   :  { %840 = vmatpush1.bf16.msra.mxu1 %v769_v3  ;;  %2148 = vrot.lane.b32.xlu1 %v7251_v42, %s5592_s13 }
 0x15e   :  { %5107 = vmatmul.mubr.msk.bf16.vlgmr.msra.gmra.mrb[36].mxu0 %vm191_vm1, %v6119_v15  ;;  %v6146_v45 = vpop.permute.xlu1 %1415 }
 0x15f   :  { %912 = vmatprep.mubr.bf16.mxu0 %v7252_v4 }
 0x160   :  { %2150 = vrot.lane.b32.xlu0 %v6001_v51, %s5592_s13  ;;  %5109 = vmatmul.mubr.msk.bf16.vlgmr.msra.gmra.mrb[36].mxu1 %vm191_vm1, %v6119_v15 }
 0x161   :  { %2152 = vrot.lane.b32.xlu1 %v5988_v38, %s5592_s13  ;;  %953 = vmatprep.mubr.bf16.mxu1 %v7252_v4 }
 0x164   :  { %2154 = vrot.lane.b32.xlu0 %v6018_v13, %s5592_s13 }
 0x165   :  { %2156 = vrot.lane.b32.xlu1 %v6033_v50, %s5592_s13 }
 0x168   :  { %2158 = vrot.lane.b32.xlu0 %v6043_v57, %s5592_s13 }
 0x169   :  { %2160 = vrot.lane.b32.xlu1 %v6037_v40, %s5592_s13 }
 0x16a   :  { %v731_v33 = vpop.permute.xlu0 %730 }
 0x16b   :  { %v751_v44 = vsel %vm746_vm4, %v729_v8, %v731_v33 }
 0x16c   :  { %v737_v14 = vpop.permute.xlu1 %736  ;;  %2162 = vrot.lane.b32.xlu0 %v6053_v23, %s5592_s13  ;;  %v775_v20 = vsel %vm201_vm0, %v751_v44, 0 }
 0x16d   :  { %2164 = vrot.lane.b32.xlu1 %v6057_v53, %s5592_s13 }
 0x16e   :  { %v735_v26 = vpop.permute.xlu0 %734 }
 0x16f   :  { %v754_v49 = vsel %vm746_vm4, %v735_v26, %v737_v14 }
 0x170   :  { %v733_v3 = vpop.permute.xlu1 %732  ;;  %5112 = vmatprep.subr.msk.bf16.mxu1 %vm201_vm0, %v754_v49  ;;  %2166 = vrot.lane.b32.xlu0 %v6065_v28, %s5592_s13 }
 0x171   :  { %v753_v63 = vsel %vm746_vm4, %v733_v3, %v735_v26  ;;  %2168 = vrot.lane.b32.xlu1 %v6074_v22, %s5592_s13  ;;  %v752_v47 = vsel %vm746_vm4, %v731_v33, %v733_v3 }
 0x172   :  { %5110 = vmatprep.subr.msk.bf16.mxu0 %vm201_vm0, %v752_v47  ;;  %v781_v8 = vsel %vm201_vm0, %v753_v63, 0 }
 0x173   :  { %881 = vmatpush1.bf16.msra.mxu0 %v775_v20  ;;  %922 = vmatpush1.bf16.msra.mxu1 %v781_v8 }
 0x174   :  { %2170 = vrot.lane.b32.xlu0 %v6103_v7, %s5592_s13  ;;  %v6182_v63 = vpop.permute.xlu1 %1419 }
 0x175   :  { %2172 = vrot.lane.b32.xlu1 %v6117_v27, %s5592_s13 }
 0x176   :  { %5111 = vmatmul.mubr.msk.bf16.vlgmr.msra.gmra.mrb[40].mxu0 %vm191_vm1, %v6119_v15  ;;  %5113 = vmatmul.mubr.msk.bf16.vlgmr.msra.gmra.mrb[40].mxu1 %vm191_vm1, %v6119_v15 }
 0x177   :  { %994 = vmatprep.mubr.bf16.mxu0 %v7252_v4  ;;  %1035 = vmatprep.mubr.bf16.mxu1 %v7252_v4 }
 0x178   :  { %2837 = vrot.lane.b32.xlu0 %v5988_v38, %s5593_s24 }
 0x179   :  { %2835 = vrot.lane.b32.xlu1 %v6001_v51, %s5593_s24 }
 0x182   :  { %v739_v47 = vpop.permute.xlu0 %738 }
 0x183   :  { %v755_v20 = vsel %vm746_vm4, %v737_v14, %v739_v47  ;;  %v741_v33 = vpop.permute.xlu1 %740  ;;  %v1079_v14 = vsel %vm201_vm0, %v5744_v52, 0  ;;  %v1085_v52 = vsel %vm201_vm0, %v5751_v56, 0 }
 0x184   :  { %v756_v26 = vsel %vm746_vm4, %v739_v47, %v741_v33  ;;  %v787_v44 = vsel %vm201_vm0, %v755_v20, 0 }
 0x185   :  { %5114 = vmatprep.subr.msk.bf16.mxu0 %vm201_vm0, %v756_v26 }
 0x186   :  { %v743_v49 = vpop.permute.xlu0 %742  ;;  %963 = vmatpush1.bf16.msra.mxu0 %v787_v44  ;;  %v1103_v44 = vsel %vm201_vm0, %v5882_v25, 0  ;;  %v1440_v25 = vsel %vm1439_vm5, %v6131_v43, %v6146_v45 }
 0x187   :  { %v757_v3 = vsel %vm746_vm4, %v741_v33, %v743_v49  ;;  %5118 = vmatprep.subr.msk.bf16.mxu0 %vm201_vm0, %v5759_v58  ;;  %v745_v8 = vpop.permute.xlu1 %744  ;;  %v1061_v58 = vld [vmem:[%s7214_s1 + $0x38] sm:$0xff] }
 0x188   :  { %v758_v31 = vsel %vm746_vm4, %v743_v49, %v745_v8  ;;  %v793_v21 = vsel %vm201_vm0, %v757_v3, 0  ;;  %v1441_v3 = vsel %vm1439_vm5, %v6146_v45, %v6144_v2 }
 0x189   :  { %5115 = vmatmul.mubr.msk.bf16.vlgmr.msra.gmra.mrb[44].mxu0 %vm191_vm1, %v6119_v15  ;;  %5116 = vmatprep.subr.msk.bf16.mxu1 %vm201_vm0, %v758_v31 }
 0x18a   :  { %v6198_v47 = vpop.permute.xlu0 %1421  ;;  %1004 = vmatpush1.bf16.msra.mxu1 %v793_v21  ;;  %1115 = vmatpush1.bf16.msra.mxu0 %v1079_v14  ;;  %v6214_v21 = vpack.c.bf16 %v1061_v58, %v1061_v58  ;;  %v1109_v58 = vsel %vm201_vm0, %v5900_v17, 0 }
 0x18b   :  { %5120 = vmatprep.subr.msk.bf16.mxu1 %vm201_vm0, %v5776_v1  ;;  %5122 = vmatprep.subr.msk.bf16.mxu0 %vm201_vm0, %v5838_v35  ;;  %v6207_v20 = vpop.permute.xlu1 %1423  ;;  %v1091_v35 = vsel %vm201_vm0, %v5815_v24, 0 }
 0x18c   :  { %1146 = vmatprep.mubr.bf16.mxu0 %v7252_v4 }
 0x18d   :  { %5117 = vmatmul.mubr.msk.bf16.vlgmr.msra.gmra.mrb[44].mxu1 %vm191_vm1, %v6119_v15 }
 0x18e   :  { %v6216_v31 = vpop.permute.xlu0 %1425  ;;  %1156 = vmatpush1.bf16.msra.mxu1 %v1085_v52  ;;  %1187 = vmatprep.mubr.bf16.mxu1 %v7252_v4 }
 0x18f   :  { %5124 = vmatprep.subr.msk.bf16.mxu1 %vm201_vm0, %v5826_v30  ;;  %v6221_v1 = vpop.permute.xlu1 %1427  ;;  %v1097_v30 = vsel %vm201_vm0, %v5832_v32, 0 }
 0x191   :  { %5119 = vmatmul.mubr.msk.bf16.vlgmr.msra.gmra.mrb[36].mxu0 %vm191_vm1, %v6214_v21 }
 0x192   :  { %1197 = vmatpush1.bf16.msra.mxu0 %v1091_v35  ;;  %v6227_v56 = vpop.permute.xlu0 %1429  ;;  %1228 = vmatprep.mubr.bf16.mxu0 %v7252_v4 }
 0x193   :  { %5126 = vmatprep.subr.msk.bf16.mxu0 %vm201_vm0, %v5890_v5  ;;  %v6232_v15 = vpop.permute.xlu1 %1431 }
 0x195   :  { %5121 = vmatmul.mubr.msk.bf16.vlgmr.msra.gmra.mrb[36].mxu1 %vm191_vm1, %v6214_v21 }
 0x196   :  { %1238 = vmatpush1.bf16.msra.mxu1 %v1097_v30  ;;  %v6238_v33 = vpop.permute.xlu0 %1433  ;;  %1269 = vmatprep.mubr.bf16.mxu1 %v7252_v4 }
 0x197   :  { %5128 = vmatprep.subr.msk.bf16.mxu1 %vm201_vm0, %v5904_v18  ;;  %v5478_v24 = vpop.permute.xlu1 %5477 }
 0x198   :  { %v5480_v26 = vunpack.i.h.bf16 %v5478_v24  ;;  %v5479_v5 = vunpack.i.l.bf16 %v5478_v24  ;;  %v1443_v24 = vsel %vm1439_vm5, %v6182_v63, %v6198_v47 }
 0x199   :  { %5123 = vmatmul.mubr.msk.bf16.vlgmr.msra.gmra.mrb[40].mxu0 %vm191_vm1, %v6214_v21 }
 0x19a   :  { %v3584_v32 = vsel %vm1439_vm5, %v5479_v5, %v5480_v26  ;;  %1279 = vmatpush1.bf16.msra.mxu0 %v1103_v44  ;;  %v6248_v49 = vpop.permute.xlu0 %1437  ;;  %1310 = vmatprep.mubr.bf16.mxu0 %v7252_v4 }
 0x19b   :  { %5130 = vmatprep.subr.msk.bf16.mxu0 %vm201_vm0, %v1441_v3  ;;  %v5488_v18 = vpop.permute.xlu1 %5487  ;;  %v3609_v52 = vmax.f32 %v5950_v11, %v3584_v32  ;;  %v1456_v32 = vsel %vm201_vm0, %v1440_v25, 0 }
 0x19c   :  { %v5490_v8 = vunpack.i.h.bf16 %v5488_v18  ;;  %v5489_v14 = vunpack.i.l.bf16 %v5488_v18 }
 0x19d   :  { %5125 = vmatmul.mubr.msk.bf16.vlgmr.msra.gmra.mrb[40].mxu1 %vm191_vm1, %v6214_v21 }
 0x19e   :  { %v3699_v35 = vmax.f32 %v5479_v5, %v5489_v14  ;;  %1320 = vmatpush1.bf16.msra.mxu1 %v1109_v58  ;;  %v5483_v30 = vpop.permute.xlu0 %5482  ;;  %v3674_v44 = vsel %vm3198_vm6, %v5489_v14, %v5490_v8  ;;  %1351 = vmatprep.mubr.bf16.mxu1 %v7252_v4  ;;  %v1372_v14 = vld [vmem:[%s7214_s1 + $0x40] sm:$0xff]  ;;  %v1442_v58 = vsel %vm1439_vm5, %v6144_v2, %v6182_v63 }
 0x19f   :  { %v5485_v43 = vunpack.i.h.bf16 %v5483_v30  ;;  %v5484_v45 = vunpack.i.l.bf16 %v5483_v30  ;;  %5132 = vmatprep.subr.msk.bf16.mxu1 %vm201_vm0, %v1443_v24  ;;  %v6269_v3 = vpop.permute.xlu1 %1805  ;;  %v3700_v17 = vmax.f32 %v3609_v52, %v3674_v44  ;;  %v1444_v44 = vsel %vm1439_vm5, %v6198_v47, %v6207_v20 }
 0x1a1   :  { %v3585_v11 = vsel %vm1439_vm5, %v5480_v26, %v5484_v45  ;;  %v3586_v5 = vsel %vm1439_vm5, %v5484_v45, %v5485_v43  ;;  %5127 = vmatmul.mubr.msk.bf16.vlgmr.msra.gmra.mrb[44].mxu0 %vm191_vm1, %v6214_v21  ;;  %v5536_v18 = vpack.i.bf16 %v3700_v17, %v3699_v35  ;;  %v1445_v26 = vsel %vm1439_vm5, %v6207_v20, %v6216_v31 }
 0x1a2   :  { %1492 = vmatpush1.bf16.msra.mxu0 %v1456_v32  ;;  %v5493_v52 = vpop.permute.xlu0 %5492  ;;  %1523 = vmatprep.mubr.bf16.mxu0 %v7252_v4  ;;  %v6290_v35 = vpack.c.bf16 %v1372_v14, %v1372_v14  ;;  %v3610_v2 = vmax.f32 %v5954_v9, %v3585_v11  ;;  %v3611_v63 = vmax.f32 %v5967_v10, %v3586_v5  ;;  %v1462_v45 = vsel %vm201_vm0, %v1442_v58, 0 }
 0x1a3   :  { %v5495_v30 = vunpack.i.h.bf16 %v5493_v52  ;;  %v5494_v24 = vunpack.i.l.bf16 %v5493_v52  ;;  %5134 = vmatprep.subr.msk.bf16.mxu0 %vm201_vm0, %v1445_v26  ;;  %v6287_v25 = vpop.permute.xlu1 %1809  ;;  %5537 = vrot.lane.b32.xlu0 %v5536_v18, %s5592_s13  ;;  %v1447_v9 = vsel %vm1439_vm5, %v6221_v1, %v6227_v56  ;;  %v1449_v14 = vsel %vm1439_vm5, %v6232_v15, %v6238_v33 }
 0x1a5   :  { %5129 = vmatmul.mubr.msk.bf16.vlgmr.msra.gmra.mrb[44].mxu1 %vm191_vm1, %v6214_v21  ;;  %v3675_v17 = vsel %vm3198_vm6, %v5490_v8, %v5494_v24  ;;  %v3676_v32 = vsel %vm3198_vm6, %v5494_v24, %v5495_v30  ;;  %v1468_v21 = vsel %vm201_vm0, %v1444_v44, 0  ;;  %v1446_v8 = vsel %vm1439_vm5, %v6216_v31, %v6221_v1 }
 0x1a6   :  { %1533 = vmatpush1.bf16.msra.mxu1 %v1462_v45  ;;  %v6302_v18 = vpop.permute.xlu0 %1807  ;;  %v3701_v10 = vmax.f32 %v3610_v2, %v3675_v17  ;;  %v3702_v11 = vmax.f32 %v3611_v63, %v3676_v32  ;;  %1564 = vmatprep.mubr.bf16.mxu1 %v7252_v4  ;;  %v1474_v1 = vsel %vm201_vm0, %v1446_v8, 0  ;;  %v1448_v44 = vsel %vm1439_vm5, %v6227_v56, %v6232_v15 }
 0x1a7   :  { %5136 = vmatprep.subr.msk.bf16.mxu1 %vm201_vm0, %v1447_v9  ;;  %v5503_v47 = vpop.permute.xlu1 %5502  ;;  %v1480_v8 = vsel %vm201_vm0, %v1448_v44, 0  ;;  %v1832_v44 = vsel %vm1831_vm7, %v6269_v3, %v6302_v18 }
 0x1a8   :  { %v5541_v20 = vpack.i.bf16 %v3702_v11, %v3701_v10  ;;  %v5505_v58 = vunpack.i.h.bf16 %v5503_v47  ;;  %v5504_v52 = vunpack.i.l.bf16 %v5503_v47  ;;  %v1848_v3 = vsel %vm201_vm0, %v1832_v44, 0 }
 0x1a9   :  { %5131 = vmatmul.mubr.msk.bf16.vlgmr.msra.gmra.mrb[36].mxu0 %vm191_vm1, %v6290_v35 }
 0x1aa   :  { %1574 = vmatpush1.bf16.msra.mxu0 %v1468_v21  ;;  %v5498_v5 = vpop.permute.xlu0 %5497  ;;  %5542 = vrot.lane.b32.xlu1 %v5541_v20, %s5592_s13  ;;  %v3677_v56 = vsel %vm3198_vm6, %v5495_v30, %v5504_v52  ;;  %v3678_v15 = vsel %vm3198_vm6, %v5504_v52, %v5505_v58  ;;  %v1833_v30 = vsel %vm1831_vm7, %v6302_v18, %v6287_v25 }
 0x1ab   :  { %v5500_v26 = vunpack.i.h.bf16 %v5498_v5  ;;  %v5499_v24 = vunpack.i.l.bf16 %v5498_v5  ;;  %5138 = vmatprep.subr.msk.bf16.mxu0 %vm201_vm0, %v1449_v14  ;;  %v1812_v2 = vpop.permute.xlu1 %1811  ;;  %1605 = vmatprep.mubr.bf16.mxu0 %v7252_v4 }
 0x1ad   :  { %v3587_v63 = vsel %vm1439_vm5, %v5485_v43, %v5499_v24  ;;  %v3588_v31 = vsel %vm1439_vm5, %v5499_v24, %v5500_v26  ;;  %5133 = vmatmul.mubr.msk.bf16.vlgmr.msra.gmra.mrb[36].mxu1 %vm191_vm1, %v6290_v35 }
 0x1ae   :  { %1615 = vmatpush1.bf16.msra.mxu1 %v1474_v1  ;;  %v6329_v45 = vpop.permute.xlu0 %5507  ;;  %2839 = vrot.lane.b32.xlu1 %v6018_v13, %s5593_s24  ;;  %v3612_v43 = vmax.f32 %v5971_v12, %v3587_v63  ;;  %v3613_v17 = vmax.f32 %v5997_v54, %v3588_v31 }
 0x1af   :  { %v5510_v32 = vunpack.i.h.bf16 %v6329_v45  ;;  %v5509_v9 = vunpack.i.l.bf16 %v6329_v45  ;;  %v6337_v10 = vpop.permute.xlu1 %5512  ;;  %1646 = vmatprep.mubr.bf16.mxu1 %v7252_v4 }
 0x1b0   :  { %v5515_v11 = vunpack.i.h.bf16 %v6337_v10  ;;  %v5514_v47 = vunpack.i.l.bf16 %v6337_v10  ;;  %v3703_v20 = vmax.f32 %v3612_v43, %v3677_v56  ;;  %v3704_v12 = vmax.f32 %v3613_v17, %v3678_v15 }
 0x1b1   :  { %v3589_v54 = vsel %vm1439_vm5, %v5500_v26, %v5509_v9  ;;  %v3590_v21 = vsel %vm1439_vm5, %v5509_v9, %v5510_v32  ;;  %5135 = vmatmul.mubr.msk.bf16.vlgmr.msra.gmra.mrb[40].mxu0 %vm191_vm1, %v6290_v35  ;;  %v1834_v15 = vsel %vm1831_vm7, %v6287_v25, %v1812_v2 }
 0x1b2   :  { %v3679_v5 = vsel %vm3198_vm6, %v5505_v58, %v5514_v47  ;;  %v3680_v14 = vsel %vm3198_vm6, %v5514_v47, %v5515_v11  ;;  %1656 = vmatpush1.bf16.msra.mxu0 %v1480_v8  ;;  %v1814_v52 = vpop.permute.xlu0 %1813  ;;  %v5546_v26 = vpack.i.bf16 %v3704_v12, %v3703_v20  ;;  %1687 = vmatprep.mubr.bf16.mxu0 %v7252_v4 }
 0x1b3   :  { %5142 = vmatprep.subr.msk.bf16.mxu0 %vm201_vm0, %v1833_v30  ;;  %v1818_v24 = vpop.permute.xlu1 %1817  ;;  %v3614_v63 = vmax.f32 %v5992_v6, %v3589_v54  ;;  %v3615_v31 = vmax.f32 %v6012_v41, %v3590_v21  ;;  %v1835_v47 = vsel %vm1831_vm7, %v1812_v2, %v1814_v52  ;;  %v1854_v54 = vsel %vm201_vm0, %v1834_v15, 0 }
 0x1b4   :  { %5547 = vrot.lane.b32.xlu0 %v5546_v26, %s5592_s13 }
 0x1b5   :  { %5137 = vmatmul.mubr.msk.bf16.vlgmr.msra.gmra.mrb[40].mxu1 %vm191_vm1, %v6290_v35  ;;  %v3705_v58 = vmax.f32 %v3614_v63, %v3679_v5  ;;  %v3706_v1 = vmax.f32 %v3615_v31, %v3680_v14 }
 0x1b6   :  { %v1816_v43 = vpop.permute.xlu0 %1815  ;;  %1728 = vmatprep.mubr.bf16.mxu1 %v7252_v4 }
 0x1b7   :  { %v1436_v17 = vpop.permute.xlu1 %1435  ;;  %v5551_v9 = vpack.i.bf16 %v3706_v1, %v3705_v58  ;;  %v1837_v18 = vsel %vm1831_vm7, %v1816_v43, %v1818_v24  ;;  %v1836_v21 = vsel %vm1831_vm7, %v1814_v52, %v1816_v43 }
 0x1b8   :  { %v1450_v6 = vsel %vm1439_vm5, %v6238_v33, %v1436_v17  ;;  %v1451_v41 = vsel %vm1439_vm5, %v1436_v17, %v6248_v49  ;;  %2843 = vrot.lane.b32.xlu0 %v6043_v57, %s5593_s24  ;;  %v1764_v49 = vld [vmem:[%s7214_s1 + $0x48] sm:$0xff]  ;;  %v1860_v5 = vsel %vm201_vm0, %v1836_v21, 0 }
 0x1b9   :  { %v1486_v56 = vsel %vm201_vm0, %v1450_v6, 0  ;;  %5552 = vrot.lane.b32.xlu1 %v5551_v9, %s5592_s13  ;;  %5139 = vmatmul.mubr.msk.bf16.vlgmr.msra.gmra.mrb[44].mxu0 %vm191_vm1, %v6290_v35  ;;  %v6393_v12 = vpack.c.bf16 %v1764_v49, %v1764_v49 }
 0x1ba   :  { %5140 = vmatprep.subr.msk.bf16.mxu1 %vm201_vm0, %v1451_v41  ;;  %1884 = vmatpush1.bf16.msra.mxu0 %v1848_v3  ;;  %v1820_v33 = vpop.permute.xlu0 %1819 }
 0x1bb   :  { %1697 = vmatpush1.bf16.msra.mxu1 %v1486_v56  ;;  %5146 = vmatprep.subr.msk.bf16.mxu0 %vm201_vm0, %v1837_v18  ;;  %v1822_v20 = vpop.permute.xlu1 %1821  ;;  %v1838_v14 = vsel %vm1831_vm7, %v1818_v24, %v1820_v33 }
 0x1bc   :  { %5144 = vmatprep.subr.msk.bf16.mxu1 %vm201_vm0, %v1835_v47  ;;  %1915 = vmatprep.mubr.bf16.mxu0 %v7252_v4  ;;  %v1839_v2 = vsel %vm1831_vm7, %v1820_v33, %v1822_v20  ;;  %v1866_v1 = vsel %vm201_vm0, %v1838_v14, 0 }
 0x1bd   :  { %2841 = vrot.lane.b32.xlu1 %v6033_v50, %s5593_s24 }
 0x1be   :  { %5141 = vmatmul.mubr.msk.bf16.vlgmr.msra.gmra.mrb[44].mxu1 %vm191_vm1, %v6290_v35  ;;  %v1824_v25 = vpop.permute.xlu0 %1823 }
 0x1bf   :  { %1925 = vmatpush1.bf16.msra.mxu1 %v1854_v54  ;;  %v1826_v8 = vpop.permute.xlu1 %1825  ;;  %1956 = vmatprep.mubr.bf16.mxu1 %v7252_v4  ;;  %v1840_v44 = vsel %vm1831_vm7, %v1822_v20, %v1824_v25 }
 0x1c0   :  { %5148 = vmatprep.subr.msk.bf16.mxu1 %vm201_vm0, %v1839_v2  ;;  %v1841_v30 = vsel %vm1831_vm7, %v1824_v25, %v1826_v8  ;;  %v1872_v10 = vsel %vm201_vm0, %v1840_v44, 0 }
 0x1c1   :  { %5143 = vmatmul.mubr.msk.bf16.vlgmr.msra.gmra.mrb[48].mxu0 %vm191_vm1, %v6393_v12 }
 0x1c2   :  { %1966 = vmatpush1.bf16.msra.mxu0 %v1860_v5  ;;  %v5518_v35 = vpop.permute.xlu0 %5517  ;;  %1997 = vmatprep.mubr.bf16.mxu0 %v7252_v4 }
 0x1c3   :  { %v5520_v52 = vunpack.i.h.bf16 %v5518_v35  ;;  %v5519_v26 = vunpack.i.l.bf16 %v5518_v35  ;;  %5150 = vmatprep.subr.msk.bf16.mxu0 %vm201_vm0, %v1841_v30  ;;  %v5523_v63 = vpop.permute.xlu1 %5522 }
 0x1c4   :  { %v5525_v31 = vunpack.i.h.bf16 %v5523_v63  ;;  %v5524_v58 = vunpack.i.l.bf16 %v5523_v63 }
 0x1c5   :  { %v3591_v43 = vsel %vm1439_vm5, %v5510_v32, %v5519_v26  ;;  %v3592_v24 = vsel %vm1439_vm5, %v5519_v26, %v5520_v52 }
 0x1c6   :  { %v3616_v17 = vmax.f32 %v6016_v48, %v3591_v43  ;;  %v3617_v9 = vmax.f32 %v6069_v29, %v3592_v24  ;;  %v3681_v6 = vsel %vm3198_vm6, %v5515_v11, %v5524_v58  ;;  %v3682_v41 = vsel %vm3198_vm6, %v5524_v58, %v5525_v31  ;;  %5145 = vmatmul.mubr.msk.bf16.vlgmr.msra.gmra.mrb[48].mxu1 %vm191_vm1, %v6393_v12  ;;  %v5528_v56 = vpop.permute.xlu0 %5527  ;;  %v2146_v58 = vld [vmem:[%s7214_s1 + $0x50] sm:$0xff] }
 0x1c7   :  { %2007 = vmatpush1.bf16.msra.mxu1 %v1866_v1  ;;  %v5530_v45 = vunpack.i.h.bf16 %v5528_v56  ;;  %v5529_v3 = vunpack.i.l.bf16 %v5528_v56  ;;  %v5533_v32 = vpop.permute.xlu1 %5532  ;;  %2038 = vmatprep.mubr.bf16.mxu1 %v7252_v4 }
 0x1c8   :  { %v5535_v18 = vunpack.i.h.bf16 %v5533_v32  ;;  %v5534_v48 = vunpack.i.l.bf16 %v5533_v32  ;;  %v3707_v33 = vmax.f32 %v3616_v17, %v3681_v6  ;;  %v3708_v29 = vmax.f32 %v3617_v9, %v3682_v41 }
 0x1c9   :  { %v3620_v11 = vmax.f32 %v6085_v46, %v5530_v45  ;;  %v3593_v49 = vsel %vm1439_vm5, %v5520_v52, %v5529_v3  ;;  %v3594_v15 = vsel %vm1439_vm5, %v5529_v3, %v5530_v45  ;;  %5147 = vmatmul.mubr.msk.bf16.vlgmr.msra.gmra.mrb[52].mxu0 %vm191_vm1, %v6393_v12  ;;  %v6460_v17 = vpack.c.bf16 %v2146_v58, %v2146_v58  ;;  %v2794_v58 = vld [vmem:[%s7214_s1 + $0x60] sm:$0xff] }
 0x1ca   :  { %v3618_v47 = vmax.f32 %v6072_v55, %v3593_v49  ;;  %v3619_v20 = vmax.f32 %v6089_v19, %v3594_v15  ;;  %v3683_v54 = vsel %vm3198_vm6, %v5525_v31, %v5534_v48  ;;  %v3684_v21 = vsel %vm3198_vm6, %v5534_v48, %v5535_v18  ;;  %2048 = vmatpush1.bf16.msra.mxu0 %v1872_v10  ;;  %v3672_v25 = vpop.permute.xlu0 %3671 }
 0x1cb   :  { %v3685_v2 = vsel %vm3198_vm6, %v5535_v18, %v3672_v25  ;;  %v1828_v46 = vpop.permute.xlu1 %1827  ;;  %v5556_v30 = vpack.i.bf16 %v3708_v29, %v3707_v33  ;;  %2079 = vmatprep.mubr.bf16.mxu0 %v7252_v4 }
 0x1cc   :  { %v3711_v5 = vmax.f32 %v3620_v11, %v3685_v2  ;;  %v3709_v14 = vmax.f32 %v3618_v47, %v3683_v54  ;;  %v3710_v35 = vmax.f32 %v3619_v20, %v3684_v21  ;;  %v1842_v55 = vsel %vm1831_vm7, %v1826_v8, %v1828_v46 }
 0x1cd   :  { %5557 = vrot.lane.b32.xlu0 %v5556_v30, %s5592_s13  ;;  %v1878_v31 = vsel %vm201_vm0, %v1842_v55, 0 }
 0x1ce   :  { %5149 = vmatmul.mubr.msk.bf16.vlgmr.msra.gmra.mrb[52].mxu1 %vm191_vm1, %v6393_v12  ;;  %v1830_v19 = vpop.permute.xlu0 %1829  ;;  %3749 = vrot.lane.b32.xlu1 %v3711_v5, %s5592_s13  ;;  %v5561_v52 = vpack.i.bf16 %v3710_v35, %v3709_v14  ;;  %v2501_v14 = vsel %vm201_vm0, %v6001_v51, 0  ;;  %v2507_v35 = vsel %vm201_vm0, %v6018_v13, 0 }
 0x1cf   :  { %v1843_v26 = vsel %vm1831_vm7, %v1828_v46, %v1830_v19  ;;  %v2149_v63 = vpop.permute.xlu1 %2148  ;;  %2120 = vmatprep.mubr.bf16.mxu1 %v7252_v4 }
 0x1d0   :  { %5152 = vmatprep.subr.msk.bf16.mxu1 %vm201_vm0, %v1843_v26 }
 0x1d1   :  { %5562 = vrot.lane.b32.xlu0 %v5561_v52, %s5592_s13  ;;  %5151 = vmatmul.mubr.msk.bf16.vlgmr.msra.gmra.mrb[56].mxu0 %vm191_vm1, %v6393_v12 }
 0x1d2   :  { %2089 = vmatpush1.bf16.msra.mxu1 %v1878_v31  ;;  %v2151_v8 = vpop.permute.xlu0 %2150  ;;  %2847 = vrot.lane.b32.xlu1 %v6053_v23, %s5593_s24 }
 0x1d3   :  { %v2174_v1 = vsel %vm746_vm4, %v2149_v63, %v2151_v8  ;;  %v2153_v44 = vpop.permute.xlu1 %2152  ;;  %2257 = vmatprep.mubr.bf16.mxu0 %v7252_v4 }
 0x1d4   :  { %v2190_v43 = vsel %vm201_vm0, %v2174_v1, 0  ;;  %v2175_v24 = vsel %vm746_vm4, %v2151_v8, %v2153_v44 }
 0x1d5   :  { %2845 = vrot.lane.b32.xlu0 %v6037_v40, %s5593_s24  ;;  %5154 = vmatprep.subr.msk.bf16.mxu0 %vm201_vm0, %v2175_v24 }
 0x1d6   :  { %5153 = vmatmul.mubr.msk.bf16.vlgmr.msra.gmra.mrb[56].mxu1 %vm191_vm1, %v6393_v12  ;;  %v2155_v9 = vpop.permute.xlu0 %2154  ;;  %2226 = vmatpush1.bf16.msra.mxu0 %v2190_v43 }
 0x1d7   :  { %v2176_v6 = vsel %vm746_vm4, %v2153_v44, %v2155_v9  ;;  %2851 = vrot.lane.b32.xlu1 %v6065_v28, %s5593_s24  ;;  %v2157_v41 = vpop.permute.xlu1 %2156  ;;  %2298 = vmatprep.mubr.bf16.mxu1 %v7252_v4 }
 0x1d8   :  { %v2196_v56 = vsel %vm201_vm0, %v2176_v6, 0  ;;  %v2177_v45 = vsel %vm746_vm4, %v2155_v9, %v2157_v41  ;;  %v6602_v9 = vpack.c.bf16 %v2794_v58, %v2794_v58 }
 0x1d9   :  { %2849 = vrot.lane.b32.xlu0 %v6057_v53, %s5593_s24  ;;  %5155 = vmatmul.mubr.msk.bf16.vlgmr.msra.gmra.mrb[48].mxu0 %vm191_vm1, %v6460_v17 }
 0x1da   :  { %5156 = vmatprep.subr.msk.bf16.mxu1 %vm201_vm0, %v2177_v45  ;;  %v2159_v12 = vpop.permute.xlu0 %2158  ;;  %2339 = vmatprep.mubr.bf16.mxu0 %v7252_v4 }
 0x1db   :  { %v2178_v3 = vsel %vm746_vm4, %v2157_v41, %v2159_v12  ;;  %2267 = vmatpush1.bf16.msra.mxu1 %v2196_v56  ;;  %2855 = vrot.lane.b32.xlu1 %v6103_v7, %s5593_s24  ;;  %v2161_v32 = vpop.permute.xlu1 %2160 }
 0x1dc   :  { %v2202_v18 = vsel %vm201_vm0, %v2178_v3, 0  ;;  %v2179_v48 = vsel %vm746_vm4, %v2159_v12, %v2161_v32 }
 0x1dd   :  { %2853 = vrot.lane.b32.xlu0 %v6074_v22, %s5593_s24  ;;  %5158 = vmatprep.subr.msk.bf16.mxu0 %vm201_vm0, %v2179_v48 }
 0x1de   :  { %5157 = vmatmul.mubr.msk.bf16.vlgmr.msra.gmra.mrb[48].mxu1 %vm191_vm1, %v6460_v17  ;;  %v2163_v33 = vpop.permute.xlu0 %2162  ;;  %2308 = vmatpush1.bf16.msra.mxu0 %v2202_v18 }
 0x1df   :  { %v2180_v29 = vsel %vm746_vm4, %v2161_v32, %v2163_v33  ;;  %2859 = vrot.lane.b32.xlu1 %v7251_v42, %s5593_s24  ;;  %v2165_v10 = vpop.permute.xlu1 %2164  ;;  %2380 = vmatprep.mubr.bf16.mxu1 %v7252_v4 }
 0x1e0   :  { %v2208_v11 = vsel %vm201_vm0, %v2180_v29, 0  ;;  %v2181_v49 = vsel %vm746_vm4, %v2163_v33, %v2165_v10 }
 0x1e1   :  { %2857 = vrot.lane.b32.xlu0 %v6117_v27, %s5593_s24  ;;  %5159 = vmatmul.mubr.msk.bf16.vlgmr.msra.gmra.mrb[52].mxu0 %vm191_vm1, %v6460_v17 }
 0x1e2   :  { %5160 = vmatprep.subr.msk.bf16.mxu1 %vm201_vm0, %v2181_v49  ;;  %v2167_v15 = vpop.permute.xlu0 %2166  ;;  %2421 = vmatprep.mubr.bf16.mxu0 %v7252_v4 }
 0x1e3   :  { %v2182_v47 = vsel %vm746_vm4, %v2165_v10, %v2167_v15  ;;  %2349 = vmatpush1.bf16.msra.mxu1 %v2208_v11  ;;  %3174 = vrot.lane.b32.xlu1 %v5988_v38, %s5594_s25  ;;  %v2169_v20 = vpop.permute.xlu1 %2168 }
 0x1e4   :  { %v2214_v54 = vsel %vm201_vm0, %v2182_v47, 0  ;;  %v2183_v21 = vsel %vm746_vm4, %v2167_v15, %v2169_v20 }
 0x1e5   :  { %3172 = vrot.lane.b32.xlu0 %v6001_v51, %s5594_s25  ;;  %5162 = vmatprep.subr.msk.bf16.mxu0 %vm201_vm0, %v2183_v21 }
 0x1e6   :  { %5161 = vmatmul.mubr.msk.bf16.vlgmr.msra.gmra.mrb[52].mxu1 %vm191_vm1, %v6460_v17  ;;  %v2171_v25 = vpop.permute.xlu0 %2170  ;;  %2390 = vmatpush1.bf16.msra.mxu0 %v2214_v54 }
 0x1e7   :  { %v2184_v2 = vsel %vm746_vm4, %v2169_v20, %v2171_v25  ;;  %3178 = vrot.lane.b32.xlu1 %v6033_v50, %s5594_s25  ;;  %5166 = vmatprep.subr.msk.bf16.mxu0 %vm201_vm0, %v5988_v38  ;;  %v2173_v46 = vpop.permute.xlu1 %2172  ;;  %v2483_v38 = vld [vmem:[%s7214_s1 + $0x58] sm:$0xff] }
 0x1e8   :  { %v2220_v30 = vsel %vm201_vm0, %v2184_v2, 0  ;;  %v2185_v5 = vsel %vm746_vm4, %v2171_v25, %v2173_v46  ;;  %2462 = vmatprep.mubr.bf16.mxu1 %v7252_v4  ;;  %v2484_v51 = vpack.c.bf16 %v2483_v38, %v2483_v38 }
 0x1e9   :  { %3176 = vrot.lane.b32.xlu0 %v6018_v13, %s5594_s25  ;;  %5163 = vmatmul.mubr.msk.bf16.vlgmr.msra.gmra.mrb[56].mxu0 %vm191_vm1, %v6460_v17  ;;  %v2519_v13 = vsel %vm201_vm0, %v6053_v23, 0 }
 0x1ea   :  { %5164 = vmatprep.subr.msk.bf16.mxu1 %vm201_vm0, %v2185_v5  ;;  %2537 = vmatpush1.bf16.msra.mxu0 %v2501_v14 }
 0x1eb   :  { %2431 = vmatpush1.bf16.msra.mxu1 %v2220_v30  ;;  %3182 = vrot.lane.b32.xlu1 %v6037_v40, %s5594_s25 }
 0x1ec   :  { %5168 = vmatprep.subr.msk.bf16.mxu1 %vm201_vm0, %v6033_v50  ;;  %5170 = vmatprep.subr.msk.bf16.mxu0 %vm201_vm0, %v6037_v40  ;;  %v2513_v50 = vsel %vm201_vm0, %v6043_v57, 0  ;;  %v2525_v40 = vsel %vm201_vm0, %v6065_v28, 0 }
 0x1ed   :  { %3180 = vrot.lane.b32.xlu0 %v6043_v57, %s5594_s25  ;;  %2568 = vmatprep.mubr.bf16.mxu0 %v7252_v4  ;;  %v2531_v57 = vsel %vm201_vm0, %v6103_v7, 0 }
 0x1ee   :  { %5165 = vmatmul.mubr.msk.bf16.vlgmr.msra.gmra.mrb[56].mxu1 %vm191_vm1, %v6460_v17 }
 0x1ef   :  { %2578 = vmatpush1.bf16.msra.mxu1 %v2507_v35  ;;  %3186 = vrot.lane.b32.xlu1 %v6057_v53, %s5594_s25 }
 0x1f0   :  { %5172 = vmatprep.subr.msk.bf16.mxu1 %vm201_vm0, %v6057_v53  ;;  %2609 = vmatprep.mubr.bf16.mxu1 %v7252_v4 }
 0x1f1   :  { %3184 = vrot.lane.b32.xlu0 %v6053_v23, %s5594_s25  ;;  %5167 = vmatmul.mubr.msk.bf16.vlgmr.msra.gmra.mrb[48].mxu0 %vm191_vm1, %v2484_v51  ;;  %v2838_v23 = vpop.permute.xlu0 %2837 }
 0x1f2   :  { %2619 = vmatpush1.bf16.msra.mxu0 %v2513_v50  ;;  %2650 = vmatprep.mubr.bf16.mxu0 %v7252_v4 }
 0x1f3   :  { %5174 = vmatprep.subr.msk.bf16.mxu0 %vm201_vm0, %v6074_v22  ;;  %3190 = vrot.lane.b32.xlu1 %v6074_v22, %s5594_s25 }
 0x1f5   :  { %3188 = vrot.lane.b32.xlu0 %v6065_v28, %s5594_s25 }
 0x1f6   :  { %5169 = vmatmul.mubr.msk.bf16.vlgmr.msra.gmra.mrb[48].mxu1 %vm191_vm1, %v2484_v51 }
 0x1f7   :  { %2660 = vmatpush1.bf16.msra.mxu1 %v2519_v13  ;;  %3194 = vrot.lane.b32.xlu1 %v6117_v27, %s5594_s25 }
 0x1f8   :  { %5176 = vmatprep.subr.msk.bf16.mxu1 %vm201_vm0, %v6117_v27  ;;  %2691 = vmatprep.mubr.bf16.mxu1 %v7252_v4  ;;  %v2836_v27 = vpop.permute.xlu1 %2835 }
 0x1f9   :  { %3192 = vrot.lane.b32.xlu0 %v6103_v7, %s5594_s25  ;;  %5171 = vmatmul.mubr.msk.bf16.vlgmr.msra.gmra.mrb[52].mxu0 %vm191_vm1, %v2484_v51  ;;  %v2861_v63 = vsel %vm1439_vm5, %v2836_v27, %v2838_v23 }
 0x1fa   :  { %2701 = vmatpush1.bf16.msra.mxu0 %v2525_v40  ;;  %2732 = vmatprep.mubr.bf16.mxu0 %v7252_v4  ;;  %v2877_v17 = vsel %vm201_vm0, %v2861_v63, 0 }
 0x1fb   :  { %3844 = vrot.lane.b32.xlu1 %v7251_v42, %s5592_s13 }
 0x1fd   :  { %3196 = vrot.lane.b32.xlu0 %v7251_v42, %s5594_s25 }
 0x1fe   :  { %5173 = vmatmul.mubr.msk.bf16.vlgmr.msra.gmra.mrb[52].mxu1 %vm191_vm1, %v2484_v51 }
 0x1ff   :  { %2742 = vmatpush1.bf16.msra.mxu1 %v2531_v57  ;;  %2773 = vmatprep.mubr.bf16.mxu1 %v7252_v4 }
 0x201   :  { %5175 = vmatmul.mubr.msk.bf16.vlgmr.msra.gmra.mrb[56].mxu0 %vm191_vm1, %v2484_v51 }
 0x202   :  { %2944 = vmatprep.mubr.bf16.mxu0 %v7252_v4 }
 0x206   :  { %5177 = vmatmul.mubr.msk.bf16.vlgmr.msra.gmra.mrb[56].mxu1 %vm191_vm1, %v2484_v51 }
 0x207   :  { %2985 = vmatprep.mubr.bf16.mxu1 %v7252_v4 }
 0x215   :  { %v5538_v53 = vpop.permute.xlu0 %5537 }
 0x216   :  { %v5540_v28 = vunpack.i.h.bf16 %v5538_v53  ;;  %v5539_v22 = vunpack.i.l.bf16 %v5538_v53 }
 0x218   :  { %v3752_v55 = vsel %vm746_vm4, %v5539_v22, %v5540_v28 }
 0x219   :  { %v6583_v19 = vpack.c.bf16 %v3752_v55, %v3752_v55 }
 0x21b   :  { %3846 = vrot.lane.b32.xlu0 %v6583_v19, %s5592_s13 }
 0x21c   :  { %v5543_v7 = vpop.permute.xlu1 %5542 }
 0x21d   :  { %v5545_v52 = vunpack.i.h.bf16 %v5543_v7  ;;  %v5544_v26 = vunpack.i.l.bf16 %v5543_v7 }
 0x21f   :  { %v3753_v31 = vsel %vm746_vm4, %v5540_v28, %v5544_v26  ;;  %v3754_v8 = vsel %vm746_vm4, %v5544_v26, %v5545_v52 }
 0x220   :  { %v6593_v1 = vpack.c.bf16 %v3753_v31, %v3753_v31  ;;  %v6595_v44 = vpack.c.bf16 %v3754_v8, %v3754_v8  ;;  %v2840_v43 = vpop.permute.xlu1 %2839 }
 0x221   :  { %v2862_v24 = vsel %vm1439_vm5, %v2838_v23, %v2840_v43 }
 0x222   :  { %5178 = vmatprep.subr.msk.bf16.mxu0 %vm201_vm0, %v2862_v24  ;;  %3848 = vrot.lane.b32.xlu1 %v6593_v1, %s5592_s13 }
 0x223   :  { %3850 = vrot.lane.b32.xlu0 %v6595_v44, %s5592_s13  ;;  %2913 = vmatpush1.bf16.msra.mxu0 %v2877_v17 }
 0x226   :  { %v5548_v6 = vpop.permute.xlu0 %5547  ;;  %5179 = vmatmul.mubr.msk.bf16.vlgmr.msra.gmra.mrb[48].mxu0 %vm191_vm1, %v6602_v9 }
 0x227   :  { %v5550_v41 = vunpack.i.h.bf16 %v5548_v6  ;;  %v5549_v56 = vunpack.i.l.bf16 %v5548_v6  ;;  %3026 = vmatprep.mubr.bf16.mxu0 %v7252_v4 }
 0x229   :  { %v3755_v45 = vsel %vm746_vm4, %v5545_v52, %v5549_v56  ;;  %v3756_v12 = vsel %vm746_vm4, %v5549_v56, %v5550_v41 }
 0x22a   :  { %v6611_v3 = vpack.c.bf16 %v3755_v45, %v3755_v45  ;;  %v6613_v32 = vpack.c.bf16 %v3756_v12, %v3756_v12  ;;  %v2844_v15 = vpop.permute.xlu0 %2843 }
 0x22b   :  { %v5553_v18 = vpop.permute.xlu1 %5552 }
 0x22c   :  { %v5555_v48 = vunpack.i.h.bf16 %v5553_v18  ;;  %v5554_v33 = vunpack.i.l.bf16 %v5553_v18  ;;  %3852 = vrot.lane.b32.xlu1 %v6611_v3, %s5592_s13  ;;  %3854 = vrot.lane.b32.xlu0 %v6613_v32, %s5592_s13 }
 0x22e   :  { %v3757_v29 = vsel %vm746_vm4, %v5550_v41, %v5554_v33  ;;  %v3758_v10 = vsel %vm746_vm4, %v5554_v33, %v5555_v48 }
 0x22f   :  { %v3781_v11 = vsel %vm31_vm2, %v3757_v29, 0.0  ;;  %v6623_v49 = vpack.c.bf16 %v3758_v10, %v3758_v10  ;;  %v2842_v47 = vpop.permute.xlu1 %2841 }
 0x230   :  { %v2863_v20 = vsel %vm1439_vm5, %v2840_v43, %v2842_v47  ;;  %v2864_v54 = vsel %vm1439_vm5, %v2842_v47, %v2844_v15  ;;  %v6627_v21 = vpack.c.bf16 %v3781_v11, %v3781_v11  ;;  %v3170_v47 = vld [vmem:[%s7214_s1 + $0x68] sm:$0xff] }
 0x231   :  { %v2883_v25 = vsel %vm201_vm0, %v2863_v20, 0  ;;  %5180 = vmatprep.subr.msk.bf16.mxu1 %vm201_vm0, %v2864_v54  ;;  %3858 = vrot.lane.b32.xlu0 %v6623_v49, %s5592_s13 }
 0x232   :  { %2954 = vmatpush1.bf16.msra.mxu1 %v2883_v25  ;;  %3856 = vrot.lane.b32.xlu1 %v6627_v21, %s5592_s13 }
 0x235   :  { %5181 = vmatmul.mubr.msk.bf16.vlgmr.msra.gmra.mrb[48].mxu1 %vm191_vm1, %v6602_v9 }
 0x236   :  { %3067 = vmatprep.mubr.bf16.mxu1 %v7252_v4 }
 0x23f   :  { %v5558_v16 = vpop.permute.xlu0 %5557 }
 0x240   :  { %v5560_v2 = vunpack.i.h.bf16 %v5558_v16  ;;  %v5559_v46 = vunpack.i.l.bf16 %v5558_v16  ;;  %v3750_v30 = vpop.permute.xlu1 %3749 }
 0x242   :  { %v3759_v5 = vsel %vm746_vm4, %v5555_v48, %v5559_v46  ;;  %v3760_v14 = vsel %vm746_vm4, %v5559_v46, %v5560_v2 }
 0x243   :  { %v6640_v38 = vpack.c.bf16 %v3759_v5, %v3759_v5  ;;  %v6642_v51 = vpack.c.bf16 %v3760_v14, %v3760_v14  ;;  %v5563_v35 = vpop.permute.xlu0 %5562 }
 0x244   :  { %v5565_v50 = vunpack.i.h.bf16 %v5563_v35  ;;  %v5564_v13 = vunpack.i.l.bf16 %v5563_v35  ;;  %v2848_v40 = vpop.permute.xlu1 %2847 }
 0x245   :  { %3860 = vrot.lane.b32.xlu1 %v6640_v38, %s5592_s13  ;;  %3862 = vrot.lane.b32.xlu0 %v6642_v51, %s5592_s13 }
 0x246   :  { %v3763_v57 = vsel %vm746_vm4, %v5565_v50, %v3750_v30  ;;  %v3761_v23 = vsel %vm746_vm4, %v5560_v2, %v5564_v13  ;;  %v3762_v53 = vsel %vm746_vm4, %v5564_v13, %v5565_v50  ;;  %v3171_v2 = vpack.c.bf16 %v3170_v47, %v3170_v47 }
 0x247   :  { %v6651_v28 = vpack.c.bf16 %v3761_v23, %v3761_v23  ;;  %v6653_v22 = vpack.c.bf16 %v3762_v53, %v3762_v53  ;;  %v2846_v27 = vpop.permute.xlu0 %2845  ;;  %v3787_v55 = vsel %vm61_vm3, %v3763_v57, 0.0  ;;  %v157_v53 = vld [vmem:[%s7214_s1 + $0x98] sm:$0xff] }
 0x248   :  { %v2865_v7 = vsel %vm1439_vm5, %v2844_v15, %v2846_v27  ;;  %v2866_v52 = vsel %vm1439_vm5, %v2846_v27, %v2848_v40  ;;  %v6665_v8 = vpack.c.bf16 %v3787_v55, %v3787_v55 }
 0x249   :  { %v2889_v26 = vsel %vm201_vm0, %v2865_v7, 0  ;;  %v2852_v63 = vpop.permute.xlu1 %2851  ;;  %5182 = vmatprep.subr.msk.bf16.mxu0 %vm201_vm0, %v2866_v52  ;;  %3864 = vrot.lane.b32.xlu1 %v6651_v28, %s5592_s13  ;;  %v158_v7 = vld [vmem:[%s7214_s1 + $0xa0] sm:$0xff] }
 0x24a   :  { %3866 = vrot.lane.b32.xlu0 %v6653_v22, %s5592_s13  ;;  %2995 = vmatpush1.bf16.msra.mxu0 %v2889_v26 }
 0x24b   :  { %v2850_v31 = vpop.permute.xlu0 %2849 }
 0x24c   :  { %v2867_v59 = vsel %vm1439_vm5, %v2848_v40, %v2850_v31  ;;  %v2868_v58 = vsel %vm1439_vm5, %v2850_v31, %v2852_v63 }
 0x24d   :  { %v2895_v43 = vsel %vm201_vm0, %v2867_v59, 0  ;;  %v2856_v24 = vpop.permute.xlu1 %2855  ;;  %5184 = vmatprep.subr.msk.bf16.mxu1 %vm201_vm0, %v2868_v58  ;;  %3868 = vrot.lane.b32.xlu1 %v6665_v8, %s5592_s13  ;;  %v1763_v59 = vld [vmem:[%s7214_s1 + $0xc0] sm:$0xff] }
 0x24e   :  { %4536 = vrot.lane.b32.xlu0 %v6583_v19, %s5593_s24  ;;  %3036 = vmatpush1.bf16.msra.mxu1 %v2895_v43 }
 0x24f   :  { %v2854_v17 = vpop.permute.xlu0 %2853  ;;  %5183 = vmatmul.mubr.msk.bf16.vlgmr.msra.gmra.mrb[52].mxu0 %vm191_vm1, %v6602_v9 }
 0x250   :  { %v2869_v6 = vsel %vm1439_vm5, %v2852_v63, %v2854_v17  ;;  %v2870_v41 = vsel %vm1439_vm5, %v2854_v17, %v2856_v24  ;;  %3108 = vmatprep.mubr.bf16.mxu0 %v7252_v4  ;;  %v678_v63 = vld [vmem:[%s7214_s1 + $0xb8] sm:$0xff] }
 0x251   :  { %v2901_v56 = vsel %vm201_vm0, %v2869_v6, 0  ;;  %v2860_v45 = vpop.permute.xlu1 %2859  ;;  %5186 = vmatprep.subr.msk.bf16.mxu0 %vm201_vm0, %v2870_v41  ;;  %4538 = vrot.lane.b32.xlu1 %v6593_v1, %s5593_s24  ;;  %v159_v6 = vld [vmem:[%s7214_s1 + $0xa8] sm:$0xff] }
 0x252   :  { %4540 = vrot.lane.b32.xlu0 %v6595_v44, %s5593_s24  ;;  %3077 = vmatpush1.bf16.msra.mxu0 %v2901_v56  ;;  %v3802_v56 = vld [vmem:[%s7214_s1 + $0xc8] sm:$0xff] }
 0x253   :  { %v2858_v12 = vpop.permute.xlu0 %2857  ;;  %5185 = vmatmul.mubr.msk.bf16.vlgmr.msra.gmra.mrb[52].mxu1 %vm191_vm1, %v6602_v9 }
 0x254   :  { %v2871_v18 = vsel %vm1439_vm5, %v2856_v24, %v2858_v12  ;;  %v2872_v48 = vsel %vm1439_vm5, %v2858_v12, %v2860_v45  ;;  %3149 = vmatprep.mubr.bf16.mxu1 %v7252_v4 }
 0x255   :  { %v2907_v33 = vsel %vm201_vm0, %v2871_v18, 0  ;;  %v3175_v29 = vpop.permute.xlu1 %3174  ;;  %5188 = vmatprep.subr.msk.bf16.mxu1 %vm201_vm0, %v2872_v48  ;;  %4542 = vrot.lane.b32.xlu1 %v6611_v3, %s5593_s24 }
 0x256   :  { %4544 = vrot.lane.b32.xlu0 %v6613_v32, %s5593_s24  ;;  %3118 = vmatpush1.bf16.msra.mxu1 %v2907_v33 }
 0x257   :  { %v3173_v10 = vpop.permute.xlu0 %3172  ;;  %5187 = vmatmul.mubr.msk.bf16.vlgmr.msra.gmra.mrb[56].mxu0 %vm191_vm1, %v6602_v9 }
 0x258   :  { %3282 = vmatprep.mubr.bf16.mxu0 %v7252_v4  ;;  %v3199_v15 = vsel %vm3198_vm6, %v3173_v10, %v3175_v29 }
 0x259   :  { %v3179_v11 = vpop.permute.xlu1 %3178  ;;  %4546 = vrot.lane.b32.xlu1 %v6627_v21, %s5593_s24  ;;  %v3215_v25 = vsel %vm201_vm0, %v3199_v15, 0 }
 0x25a   :  { %4548 = vrot.lane.b32.xlu0 %v6623_v49, %s5593_s24 }
 0x25b   :  { %v3177_v20 = vpop.permute.xlu0 %3176  ;;  %5189 = vmatmul.mubr.msk.bf16.vlgmr.msra.gmra.mrb[56].mxu1 %vm191_vm1, %v6602_v9 }
 0x25c   :  { %v3200_v54 = vsel %vm3198_vm6, %v3175_v29, %v3177_v20  ;;  %3323 = vmatprep.mubr.bf16.mxu1 %v7252_v4  ;;  %v3201_v46 = vsel %vm3198_vm6, %v3177_v20, %v3179_v11 }
 0x25d   :  { %v3183_v16 = vpop.permute.xlu1 %3182  ;;  %5190 = vmatprep.subr.msk.bf16.mxu0 %vm201_vm0, %v3200_v54  ;;  %4550 = vrot.lane.b32.xlu1 %v6640_v38, %s5593_s24  ;;  %v3221_v5 = vsel %vm201_vm0, %v3201_v46, 0 }
 0x25e   :  { %4552 = vrot.lane.b32.xlu0 %v6642_v51, %s5593_s24  ;;  %3251 = vmatpush1.bf16.msra.mxu0 %v3215_v25 }
 0x25f   :  { %v3181_v9 = vpop.permute.xlu0 %3180 }
 0x260   :  { %v3202_v30 = vsel %vm3198_vm6, %v3179_v11, %v3181_v9  ;;  %v3203_v35 = vsel %vm3198_vm6, %v3181_v9, %v3183_v16 }
 0x261   :  { %5191 = vmatmul.mubr.msk.bf16.vlgmr.msra.gmra.mrb[48].mxu0 %vm191_vm1, %v3171_v2  ;;  %5192 = vmatprep.subr.msk.bf16.mxu1 %vm201_vm0, %v3202_v30  ;;  %v3187_v14 = vpop.permute.xlu1 %3186  ;;  %v3227_v40 = vsel %vm201_vm0, %v3203_v35, 0 }
 0x262   :  { %4554 = vrot.lane.b32.xlu1 %v6651_v28, %s5593_s24  ;;  %4556 = vrot.lane.b32.xlu0 %v6653_v22, %s5593_s24 }
 0x263   :  { %3292 = vmatpush1.bf16.msra.mxu1 %v3221_v5  ;;  %v3185_v50 = vpop.permute.xlu0 %3184  ;;  %3364 = vmatprep.mubr.bf16.mxu0 %v7252_v4 }
 0x264   :  { %v3204_v13 = vsel %vm3198_vm6, %v3183_v16, %v3185_v50  ;;  %v3205_v57 = vsel %vm3198_vm6, %v3185_v50, %v3187_v14 }
 0x265   :  { %5194 = vmatprep.subr.msk.bf16.mxu0 %vm201_vm0, %v3204_v13  ;;  %v3191_v27 = vpop.permute.xlu1 %3190  ;;  %v3233_v52 = vsel %vm201_vm0, %v3205_v57, 0 }
 0x266   :  { %5193 = vmatmul.mubr.msk.bf16.vlgmr.msra.gmra.mrb[48].mxu1 %vm191_vm1, %v3171_v2  ;;  %4558 = vrot.lane.b32.xlu1 %v6665_v8, %s5593_s24 }
 0x267   :  { %4560 = vrot.lane.b32.xlu0 %v7251_v42, %s5593_s24  ;;  %3333 = vmatpush1.bf16.msra.mxu0 %v3227_v40  ;;  %v3189_v23 = vpop.permute.xlu0 %3188  ;;  %s5566_s24 = scalar_lea.vmem %s5075_s23, 16 }
 0x268   :  { %v3206_v55 = vsel %vm3198_vm6, %v3187_v14, %v3189_v23  ;;  %3405 = vmatprep.mubr.bf16.mxu1 %v7252_v4  ;;  %v3207_v42 = vsel %vm3198_vm6, %v3189_v23, %v3191_v27  ;;  %p5567_p0 = scmp.ne.s32.totalorder %s5075_s23, %s5566_s24 }
 0x269   :  { %5196 = vmatprep.subr.msk.bf16.mxu1 %vm201_vm0, %v3206_v55  ;;  %v3239_v58 = vsel %vm201_vm0, %v3207_v42, 0  ;;  %v3195_v43 = vpop.permute.xlu1 %3194 }
 0x26a   :  { %5195 = vmatmul.mubr.msk.bf16.vlgmr.msra.gmra.mrb[52].mxu0 %vm191_vm1, %v3171_v2  ;;  %173 = vperm.xlu1 %5475, %v157_v53   ;;  %v3803_v53 = vld [vmem:[%s7214_s1 + $0x70] sm:$0xff] }
 0x26b   :  { %178 = vperm.xlu0 %5474, %v158_v7   ;;  %3374 = vmatpush1.bf16.msra.mxu1 %v3233_v52  ;;  %v3193_v26 = vpop.permute.xlu0 %3192 }
 0x26c   :  { %v3208_v31 = vsel %vm3198_vm6, %v3191_v27, %v3193_v26  ;;  %3446 = vmatprep.mubr.bf16.mxu0 %v7252_v4  ;;  %v3209_v24 = vsel %vm3198_vm6, %v3193_v26, %v3195_v43  ;;  %v3817_v26 = vpack.c.bf16 %v3803_v53, %v3803_v53 }
 0x26d   :  { %5198 = vmatprep.subr.msk.bf16.mxu0 %vm201_vm0, %v3208_v31  ;;  %v3245_v45 = vsel %vm201_vm0, %v3209_v24, 0  ;;  %v3845_v50 = vpop.permute.xlu1 %3844 }
 0x26e   :  { %5197 = vmatmul.mubr.msk.bf16.vlgmr.msra.gmra.mrb[52].mxu1 %vm191_vm1, %v3171_v2  ;;  %1046 = vperm.xlu1 %5475, %v678_v63  }
 0x26f   :  { %2131 = vperm.xlu0 %5474, %v1763_v59   ;;  %3415 = vmatpush1.bf16.msra.mxu0 %v3239_v58  ;;  %v3197_v17 = vpop.permute.xlu0 %3196 }
 0x270   :  { %v3210_v41 = vsel %vm3198_vm6, %v3195_v43, %v3197_v17  ;;  %3487 = vmatprep.mubr.bf16.mxu1 %v7252_v4 }
 0x271   :  { %5200 = vmatprep.subr.msk.bf16.mxu1 %vm201_vm0, %v3210_v41 }
 0x272   :  { %5199 = vmatmul.mubr.msk.bf16.vlgmr.msra.gmra.mrb[56].mxu0 %vm191_vm1, %v3171_v2  ;;  %183 = vperm.xlu1 %5475, %v159_v6  }
 0x273   :  { %4169 = vperm.xlu0 %5474, %v3802_v56   ;;  %3456 = vmatpush1.bf16.msra.mxu1 %v3245_v45 }
 0x274   :  { %3953 = vmatprep.mubr.bf16.mxu0 %v7252_v4 }
 0x276   :  { %5201 = vmatmul.mubr.msk.bf16.vlgmr.msra.gmra.mrb[56].mxu1 %vm191_vm1, %v3171_v2 }
 0x277   :  { %3994 = vmatprep.mubr.bf16.mxu1 %v7252_v4 }
 0x27c   :  { %v6776_v12 = vpop.f32.mrb[36].mxu0 }
 0x27d   :  { %v6778_v18 = vpop.f32.mrb[37].mxu0 }
 0x27e   :  { %v1529_v48 = vpop.f32.mrb[38].mxu0 }
 0x27f   :  { %v1530_v33 = vpop.f32.mrb[39].mxu0 }
 0x280   :  { %v6780_v29 = vpop.f32.mrb[36].mxu1 }
 0x281   :  { %v6782_v10 = vpop.f32.mrb[37].mxu1 }
 0x282   :  { %v1570_v11 = vpop.f32.mrb[38].mxu1 }
 0x283   :  { %v1571_v15 = vpop.f32.mrb[39].mxu1 }
 0x284   :  { %v6784_v47 = vpop.f32.mrb[40].mxu0 }
 0x285   :  { %v6786_v20 = vpop.f32.mrb[41].mxu0 }
 0x286   :  { %v1611_v54 = vpop.f32.mrb[42].mxu0 }
 0x287   :  { %v1612_v25 = vpop.f32.mrb[43].mxu0 }
 0x288   :  { %v6788_v16 = vpop.f32.mrb[40].mxu1 }
 0x289   :  { %v6790_v2 = vpop.f32.mrb[41].mxu1 }
 0x28a   :  { %v1652_v46 = vpop.f32.mrb[42].mxu1 }
 0x28b   :  { %v1653_v9 = vpop.f32.mrb[43].mxu1 }
 0x28c   :  { %v6792_v30 = vpop.f32.mrb[44].mxu0 }
 0x28d   :  { %v6794_v5 = vpop.f32.mrb[45].mxu0  ;;  %v3847_v13 = vpop.permute.xlu0 %3846 }
 0x28e   :  { %v1693_v14 = vpop.f32.mrb[46].mxu0  ;;  %v3870_v23 = vsel %vm746_vm4, %v3845_v50, %v3847_v13 }
 0x28f   :  { %v1694_v35 = vpop.f32.mrb[47].mxu0  ;;  %v3886_v42 = vsel %vm201_vm0, %v3870_v23, 0 }
 0x291   :  { %v6796_v40 = vpop.f32.mrb[44].mxu1 }
 0x292   :  { %v6798_v57 = vpop.f32.mrb[45].mxu1 }
 0x293   :  { %v1734_v27 = vpop.f32.mrb[46].mxu1 }
 0x294   :  { %v3849_v55 = vpop.permute.xlu1 %3848  ;;  %v1735_v7 = vpop.f32.mrb[47].mxu1 }
 0x295   :  { %v3871_v52 = vsel %vm746_vm4, %v3847_v13, %v3849_v55  ;;  %v3851_v63 = vpop.permute.xlu0 %3850  ;;  %v4184_v7 = vld [vmem:[%s7214_s1 + $0x78] sm:$0xff] }
 0x296   :  { %5202 = vmatprep.subr.msk.bf16.mxu0 %vm201_vm0, %v3871_v52  ;;  %v3872_v31 = vsel %vm746_vm4, %v3849_v55, %v3851_v63  ;;  %v4202_v55 = vsel %vm201_vm0, %v6583_v19, 0  ;;  %v4208_v19 = vsel %vm201_vm0, %v6595_v44, 0  ;;  %v4220_v44 = vsel %vm201_vm0, %v6623_v49, 0 }
 0x297   :  { %3922 = vmatpush1.bf16.msra.mxu0 %v3886_v42  ;;  %v3892_v43 = vsel %vm201_vm0, %v3872_v31, 0  ;;  %v4185_v42 = vpack.c.bf16 %v4184_v7, %v4184_v7  ;;  %v4232_v49 = vsel %vm201_vm0, %v6653_v22, 0  ;;  %v4495_v22 = vld [vmem:[%s7214_s1 + $0x80] sm:$0xff] }
 0x29a   :  { %5203 = vmatmul.mubr.msk.bf16.vlgmr.msra.gmra.mrb[60].mxu0 %vm191_vm1, %v3817_v26 }
 0x29b   :  { %4035 = vmatprep.mubr.bf16.mxu0 %v7252_v4 }
 0x29e   :  { %v3853_v59 = vpop.permute.xlu1 %3852  ;;  %v3855_v24 = vpop.permute.xlu0 %3854 }
 0x29f   :  { %v3873_v58 = vsel %vm746_vm4, %v3851_v63, %v3853_v59  ;;  %v3874_v17 = vsel %vm746_vm4, %v3853_v59, %v3855_v24  ;;  %v4226_v63 = vsel %vm201_vm0, %v6642_v51, 0 }
 0x2a0   :  { %5204 = vmatprep.subr.msk.bf16.mxu1 %vm201_vm0, %v3873_v58  ;;  %v3898_v56 = vsel %vm201_vm0, %v3874_v17, 0 }
 0x2a1   :  { %3963 = vmatpush1.bf16.msra.mxu1 %v3892_v43 }
 0x2a3   :  { %v3859_v45 = vpop.permute.xlu0 %3858 }
 0x2a4   :  { %v3857_v6 = vpop.permute.xlu1 %3856  ;;  %5205 = vmatmul.mubr.msk.bf16.vlgmr.msra.gmra.mrb[60].mxu1 %vm191_vm1, %v3817_v26 }
 0x2a5   :  { %v3875_v41 = vsel %vm746_vm4, %v3855_v24, %v3857_v6  ;;  %4076 = vmatprep.mubr.bf16.mxu1 %v7252_v4  ;;  %v3876_v48 = vsel %vm746_vm4, %v3857_v6, %v3859_v45 }
 0x2a6   :  { %5206 = vmatprep.subr.msk.bf16.mxu0 %vm201_vm0, %v3875_v41  ;;  %v3904_v54 = vsel %vm201_vm0, %v3876_v48, 0 }
 0x2a7   :  { %4004 = vmatpush1.bf16.msra.mxu0 %v3898_v56  ;;  %v4509_v56 = vpack.c.bf16 %v4495_v22, %v4495_v22 }
 0x2aa   :  { %5207 = vmatmul.mubr.msk.bf16.vlgmr.msra.gmra.mrb[64].mxu0 %vm191_vm1, %v3817_v26 }
 0x2ab   :  { %4117 = vmatprep.mubr.bf16.mxu0 %v7252_v4 }
 0x2b7   :  { %v3861_v33 = vpop.permute.xlu1 %3860  ;;  %v3863_v11 = vpop.permute.xlu0 %3862 }
 0x2b8   :  { %v3877_v15 = vsel %vm746_vm4, %v3859_v45, %v3861_v33  ;;  %v3878_v25 = vsel %vm746_vm4, %v3861_v33, %v3863_v11 }
 0x2b9   :  { %5208 = vmatprep.subr.msk.bf16.mxu1 %vm201_vm0, %v3877_v15  ;;  %v3910_v35 = vsel %vm201_vm0, %v3878_v25, 0 }
 0x2ba   :  { %4045 = vmatpush1.bf16.msra.mxu1 %v3904_v54 }
 0x2bb   :  { %v3865_v46 = vpop.permute.xlu1 %3864 }
 0x2bc   :  { %v3879_v9 = vsel %vm746_vm4, %v3863_v11, %v3865_v46  ;;  %v3867_v14 = vpop.permute.xlu0 %3866 }
 0x2bd   :  { %5209 = vmatmul.mubr.msk.bf16.vlgmr.msra.gmra.mrb[64].mxu1 %vm191_vm1, %v3817_v26  ;;  %5210 = vmatprep.subr.msk.bf16.mxu0 %vm201_vm0, %v3879_v9  ;;  %v3880_v50 = vsel %vm746_vm4, %v3865_v46, %v3867_v14 }
 0x2be   :  { %4086 = vmatpush1.bf16.msra.mxu0 %v3910_v35  ;;  %4158 = vmatprep.mubr.bf16.mxu1 %v7252_v4  ;;  %v3916_v27 = vsel %vm201_vm0, %v3880_v50, 0 }
 0x2bf   :  { %v3869_v13 = vpop.permute.xlu1 %3868  ;;  %5214 = vmatprep.subr.msk.bf16.mxu0 %vm201_vm0, %v6593_v1 }
 0x2c0   :  { %v3881_v23 = vsel %vm746_vm4, %v3867_v14, %v3869_v13  ;;  %v4537_v53 = vpop.permute.xlu0 %4536 }
 0x2c1   :  { %5211 = vmatmul.mubr.msk.bf16.vlgmr.msra.gmra.mrb[68].mxu0 %vm191_vm1, %v3817_v26  ;;  %5212 = vmatprep.subr.msk.bf16.mxu1 %vm201_vm0, %v3881_v23 }
 0x2c2   :  { %4127 = vmatpush1.bf16.msra.mxu1 %v3916_v27  ;;  %4238 = vmatpush1.bf16.msra.mxu0 %v4202_v55 }
 0x2c3   :  { %5216 = vmatprep.subr.msk.bf16.mxu1 %vm201_vm0, %v6611_v3  ;;  %5218 = vmatprep.subr.msk.bf16.mxu0 %vm201_vm0, %v6627_v21  ;;  %v4539_v1 = vpop.permute.xlu1 %4538  ;;  %v4214_v3 = vsel %vm201_vm0, %v6613_v32, 0 }
 0x2c4   :  { %4269 = vmatprep.mubr.bf16.mxu0 %v7252_v4  ;;  %v4541_v52 = vpop.permute.xlu0 %4540 }
 0x2c5   :  { %5213 = vmatmul.mubr.msk.bf16.vlgmr.msra.gmra.mrb[68].mxu1 %vm191_vm1, %v3817_v26 }
 0x2c6   :  { %4279 = vmatpush1.bf16.msra.mxu1 %v4208_v19  ;;  %4310 = vmatprep.mubr.bf16.mxu1 %v7252_v4 }
 0x2c7   :  { %5220 = vmatprep.subr.msk.bf16.mxu1 %vm201_vm0, %v6640_v38  ;;  %v4543_v21 = vpop.permute.xlu1 %4542 }
 0x2c8   :  { %v4545_v26 = vpop.permute.xlu0 %4544  ;;  %v4564_v43 = vsel %vm1439_vm5, %v4541_v52, %v4543_v21 }
 0x2c9   :  { %5215 = vmatmul.mubr.msk.bf16.vlgmr.msra.gmra.mrb[60].mxu0 %vm191_vm1, %v4185_v42  ;;  %v4565_v31 = vsel %vm1439_vm5, %v4543_v21, %v4545_v26  ;;  %v4584_v17 = vsel %vm201_vm0, %v4564_v43, 0 }
 0x2ca   :  { %4320 = vmatpush1.bf16.msra.mxu0 %v4214_v3  ;;  %4351 = vmatprep.mubr.bf16.mxu0 %v7252_v4 }
 0x2cb   :  { %5222 = vmatprep.subr.msk.bf16.mxu0 %vm201_vm0, %v6651_v28  ;;  %v4547_v32 = vpop.permute.xlu1 %4546  ;;  %v4563_v28 = vsel %vm1439_vm5, %v4539_v1, %v4541_v52 }
 0x2cc   :  { %v4549_v38 = vpop.permute.xlu0 %4548  ;;  %v4566_v45 = vsel %vm1439_vm5, %v4545_v26, %v4547_v32 }
 0x2cd   :  { %5217 = vmatmul.mubr.msk.bf16.vlgmr.msra.gmra.mrb[60].mxu1 %vm191_vm1, %v4185_v42  ;;  %v4567_v24 = vsel %vm1439_vm5, %v4547_v32, %v4549_v38  ;;  %v4590_v33 = vsel %vm201_vm0, %v4566_v45, 0  ;;  %v7258_v45 = vld [vmem:[#allocation7_spill] sm:$0xff] }
 0x2ce   :  { %4361 = vmatpush1.bf16.msra.mxu1 %v4220_v44  ;;  %4392 = vmatprep.mubr.bf16.mxu1 %v7252_v4 }
 0x2cf   :  { %5224 = vmatprep.subr.msk.bf16.mxu1 %vm201_vm0, %v6665_v8  ;;  %v4562_v8 = vsel %vm1439_vm5, %v4537_v53, %v4539_v1  ;;  %v4551_v51 = vpop.permute.xlu1 %4550 }
 0x2d0   :  { %v4553_v59 = vpop.permute.xlu0 %4552  ;;  %v4578_v58 = vsel %vm201_vm0, %v4562_v8, 0  ;;  %v4568_v11 = vsel %vm1439_vm5, %v4549_v38, %v4551_v51  ;;  %v7254_v38 = vld [vmem:[#allocation25_spill] sm:$0xff]  ;;  %v7255_v8 = vld [vmem:[#allocation24_spill] sm:$0xff] }
 0x2d1   :  { %5219 = vmatmul.mubr.msk.bf16.vlgmr.msra.gmra.mrb[64].mxu0 %vm191_vm1, %v4185_v42  ;;  %v4569_v48 = vsel %vm1439_vm5, %v4551_v51, %v4553_v59  ;;  %v4596_v46 = vsel %vm201_vm0, %v4568_v11, 0 }
 0x2d2   :  { %4402 = vmatpush1.bf16.msra.mxu0 %v4226_v63  ;;  %4433 = vmatprep.mubr.bf16.mxu0 %v7252_v4 }
 0x2d3   :  { %5226 = vmatprep.subr.msk.bf16.mxu0 %vm201_vm0, %v4563_v28 }
 0x2d4   :  { %v4555_v6 = vpop.permute.xlu1 %4554  ;;  %v4557_v41 = vpop.permute.xlu0 %4556 }
 0x2d5   :  { %5221 = vmatmul.mubr.msk.bf16.vlgmr.msra.gmra.mrb[64].mxu1 %vm191_vm1, %v4185_v42  ;;  %v4571_v15 = vsel %vm1439_vm5, %v4555_v6, %v4557_v41  ;;  %v4570_v9 = vsel %vm1439_vm5, %v4553_v59, %v4555_v6 }
 0x2d6   :  { %4443 = vmatpush1.bf16.msra.mxu1 %v4232_v49  ;;  %4474 = vmatprep.mubr.bf16.mxu1 %v7252_v4  ;;  %v4602_v35 = vsel %vm201_vm0, %v4570_v9, 0 }
 0x2d7   :  { %5228 = vmatprep.subr.msk.bf16.mxu1 %vm201_vm0, %v4565_v31 }
 0x2d8   :  { %v4559_v54 = vpop.permute.xlu1 %4558 }
 0x2d9   :  { %5223 = vmatmul.mubr.msk.bf16.vlgmr.msra.gmra.mrb[68].mxu0 %vm191_vm1, %v4185_v42  ;;  %v4561_v25 = vpop.permute.xlu0 %4560  ;;  %v4572_v50 = vsel %vm1439_vm5, %v4557_v41, %v4559_v54 }
 0x2da   :  { %4614 = vmatpush1.bf16.msra.mxu0 %v4578_v58  ;;  %4645 = vmatprep.mubr.bf16.mxu0 %v7252_v4  ;;  %v4573_v14 = vsel %vm1439_vm5, %v4559_v54, %v4561_v25  ;;  %v4608_v23 = vsel %vm201_vm0, %v4572_v50, 0  ;;  %v99_v54 = vld [vmem:[%s7213_s0 + $0x68] sm:$0xff] }
 0x2db   :  { %5230 = vmatprep.subr.msk.bf16.mxu0 %vm201_vm0, %v4567_v24  ;;  %v111_v25 = vld [vmem:[%s7213_s0 + $0xc8] sm:$0xff] }
 0x2dd   :  { %5225 = vmatmul.mubr.msk.bf16.vlgmr.msra.gmra.mrb[68].mxu1 %vm191_vm1, %v4185_v42 }
 0x2de   :  { %4655 = vmatpush1.bf16.msra.mxu1 %v4584_v17  ;;  %4686 = vmatprep.mubr.bf16.mxu1 %v7252_v4  ;;  %v7257_v17 = vld [vmem:[#allocation6_spill] sm:$0xff] }
 0x2df   :  { %5232 = vmatprep.subr.msk.bf16.mxu1 %vm201_vm0, %v4569_v48 }
 0x2e1   :  { %5227 = vmatmul.mubr.msk.bf16.vlgmr.msra.gmra.mrb[60].mxu0 %vm191_vm1, %v4509_v56 }
 0x2e2   :  { %4696 = vmatpush1.bf16.msra.mxu0 %v4590_v33  ;;  %4727 = vmatprep.mubr.bf16.mxu0 %v7252_v4 }
 0x2e3   :  { %5234 = vmatprep.subr.msk.bf16.mxu0 %vm201_vm0, %v4571_v15 }
 0x2e5   :  { %5229 = vmatmul.mubr.msk.bf16.vlgmr.msra.gmra.mrb[60].mxu1 %vm191_vm1, %v4509_v56 }
 0x2e6   :  { %4737 = vmatpush1.bf16.msra.mxu1 %v4596_v46  ;;  %4768 = vmatprep.mubr.bf16.mxu1 %v7252_v4 }
 0x2e7   :  { %5236 = vmatprep.subr.msk.bf16.mxu1 %vm201_vm0, %v4573_v14 }
 0x2e9   :  { %v174_v13 = vpop.permute.xlu1 %173  ;;  %5231 = vmatmul.mubr.msk.bf16.vlgmr.msra.gmra.mrb[64].mxu0 %vm191_vm1, %v4509_v56 }
 0x2ea   :  { %4778 = vmatpush1.bf16.msra.mxu0 %v4602_v35  ;;  %4809 = vmatprep.mubr.bf16.mxu0 %v7252_v4  ;;  %v283_v53 = vadd.f32 %v5762_v60, %v174_v13  ;;  %v285_v27 = vadd.f32 %v5764_v61, %v174_v13  ;;  %v346_v55 = vadd.f32 %v5766_v62, %v174_v13  ;;  %v6955_v24 = vpop.permute.xlu0 %178 }
 0x2eb   :  { %v348_v1 = vadd.f32 %v5774_v0, %v174_v13  ;;  %v409_v52 = vadd.f32 %v5836_v34, %v174_v13  ;;  %v411_v19 = vadd.f32 %v5840_v36, %v174_v13  ;;  %v472_v42 = vadd.f32 %v5842_v37, %v174_v13 }
 0x2ec   :  { %v537_v63 = vadd.f32 %v7254_v38, %v174_v13  ;;  %v598_v31 = vadd.f32 %v7255_v8, %v174_v13  ;;  %v287_v6 = vadd.f32 %v7257_v17, %v6955_v24  ;;  %v289_v48 = vadd.f32 %v7258_v45, %v6955_v24 }
 0x2ed   :  { %v1047_v7 = vpop.permute.xlu1 %1046  ;;  %5233 = vmatmul.mubr.msk.bf16.vlgmr.msra.gmra.mrb[64].mxu1 %vm191_vm1, %v4509_v56 }
 0x2ee   :  { %4819 = vmatpush1.bf16.msra.mxu1 %v4608_v23  ;;  %4850 = vmatprep.mubr.bf16.mxu1 %v7252_v4  ;;  %v5238_v60 = vadd.f32 %v6776_v12, %v1047_v7  ;;  %v5239_v61 = vadd.f32 %v6778_v18, %v1047_v7  ;;  %v5240_v62 = vadd.f32 %v6780_v29, %v1047_v7  ;;  %v6957_v22 = vpop.permute.xlu0 %2131 }
 0x2ef   :  { %v5241_v3 = vadd.f32 %v6782_v10, %v1047_v7  ;;  %v5242_v21 = vadd.f32 %v6784_v47, %v1047_v7  ;;  %v5243_v0 = vadd.f32 %v6786_v20, %v1047_v7  ;;  %v5244_v34 = vadd.f32 %v6788_v16, %v1047_v7  ;;  %v7253_v20 = vld [vmem:[#allocation23_spill] sm:$0xff] }
 0x2f0   :  { %v4871_v36 = vadd.f32 %v5238_v60, %v283_v53  ;;  %v4872_v26 = vadd.f32 %v5239_v61, %v285_v27  ;;  %v4873_v37 = vadd.f32 %v5240_v62, %v346_v55  ;;  %v474_v29 = vadd.f32 %v5848_v39, %v174_v13  ;;  %v7259_v53 = vld [vmem:[#allocation8_spill] sm:$0xff] }
 0x2f1   :  { %5235 = vmatmul.mubr.msk.bf16.vlgmr.msra.gmra.mrb[68].mxu0 %vm191_vm1, %v4509_v56  ;;  %v4874_v4 = vadd.f32 %v5241_v3, %v348_v1  ;;  %v6928_v44 = vadd.f32 %v5242_v21, %v409_v52  ;;  %v6930_v12 = vadd.f32 %v5243_v0, %v411_v19  ;;  %v6932_v18 = vadd.f32 %v5244_v34, %v472_v42  ;;  %v100_v52 = vld [vmem:[%s7213_s0 + $0x70] sm:$0xff]  ;;  %v7260_v42 = vld [vmem:[#allocation9_spill] sm:$0xff] }
 0x2f2   :  { %v5245_v10 = vadd.f32 %v6790_v2, %v1047_v7  ;;  %v535_v16 = vadd.f32 %v7253_v20, %v174_v13  ;;  %v5246_v32 = vadd.f32 %v6792_v30, %v1047_v7  ;;  %v5247_v28 = vadd.f32 %v6794_v5, %v1047_v7  ;;  %v7256_v2 = vld [vmem:[#allocation26_spill] sm:$0xff]  ;;  %v112_v19 = vld [vmem:[%s7213_s0 + $0xd0] sm:$0xff]  ;;  %v101_v0 = vld [vmem:[%s7213_s0 + $0x78] sm:$0xff] }
 0x2f3   :  { %v5248_v39 = vadd.f32 %v6796_v40, %v1047_v7  ;;  %v600_v59 = vadd.f32 %v7256_v2, %v174_v13  ;;  %v5249_v58 = vadd.f32 %v6798_v57, %v1047_v7  ;;  %v110_v57 = vld [vmem:[%s7213_s0 + $0xc0] sm:$0xff]  ;;  %v4884_v13 = vmul.f32 %v4872_v26, %v99_v54  ;;  %v113_v34 = vld [vmem:[%s7213_s0 + $0xd8] sm:$0xff] }
 0x2f4   :  { %v6936_v47 = vadd.f32 %v5245_v10, %v474_v29  ;;  %v6943_v49 = vadd.f32 %v5246_v32, %v535_v16  ;;  %v6947_v51 = vadd.f32 %v5247_v28, %v537_v63  ;;  %v350_v27 = vadd.f32 %v7259_v53, %v6955_v24  ;;  %v7261_v16 = vld [vmem:[#allocation15_spill] sm:$0xff]  ;;  %v7262_v2 = vld [vmem:[#allocation16_spill] sm:$0xff] }
 0x2f5   :  { %5237 = vmatmul.mubr.msk.bf16.vlgmr.msra.gmra.mrb[68].mxu1 %vm191_vm1, %v4509_v56  ;;  %v6951_v43 = vadd.f32 %v5248_v39, %v598_v31  ;;  %v6953_v30 = vadd.f32 %v5249_v58, %v600_v59  ;;  %v98_v56 = vld [vmem:[%s7213_s0 + $0x60] sm:$0xff]  ;;  %v352_v60 = vadd.f32 %v7260_v42, %v6955_v24  ;;  %v4885_v10 = vmul.f32 %v4873_v37, %v100_v52 }
 0x2f6   :  { %v4883_v14 = vmul.f32 %v4871_v36, %v98_v56  ;;  %v413_v32 = vadd.f32 %v7261_v16, %v6955_v24  ;;  %v4886_v28 = vmul.f32 %v4874_v4, %v101_v0  ;;  %v102_v31 = vld [vmem:[%s7213_s0 + $0x80] sm:$0xff]  ;;  %v415_v37 = vadd.f32 %v7262_v2, %v6955_v24  ;;  %v103_v4 = vld [vmem:[%s7213_s0 + $0x88] sm:$0xff] }
 0x2f7   :  { %v114_v39 = vld [vmem:[%s7213_s0 + $0xe0] sm:$0xff]  ;;  %v4887_v45 = vmul.f32 %v6928_v44, %v102_v31 }
 0x2f8   :  { %v7264_v44 = vld [vmem:[#allocation18_spill] sm:$0xff] }
 0x334   :  { %v3284_v5 = vpop.f32.mrb[48].mxu0 }
 0x335   :  { %v5250_v40 = vadd.f32 %v3284_v5, %v6957_v22  ;;  %v3286_v41 = vpop.f32.mrb[49].mxu0 }
 0x336   :  { %v5251_v33 = vadd.f32 %v3286_v41, %v6957_v22  ;;  %v3288_v11 = vpop.f32.mrb[50].mxu0 }
 0x337   :  { %v4895_v15 = vadd.f32 %v5250_v40, %v287_v6  ;;  %v3289_v46 = vpop.f32.mrb[51].mxu0  ;;  %v115_v6 = vld [vmem:[%s7213_s0 + $0xe8] sm:$0xff] }
 0x338   :  { %v4896_v9 = vadd.f32 %v5251_v33, %v289_v48  ;;  %v7263_v33 = vld [vmem:[#allocation17_spill] sm:$0xff] }
 0x339   :  { %v4907_v35 = vmul.f32 %v4895_v15, %v110_v57  ;;  %v3325_v50 = vpop.f32.mrb[48].mxu1  ;;  %v476_v11 = vadd.f32 %v7263_v33, %v6955_v24 }
 0x33a   :  { %v4908_v23 = vmul.f32 %v4896_v9, %v111_v25  ;;  %v5252_v55 = vadd.f32 %v3325_v50, %v6957_v22  ;;  %v3327_v7 = vpop.f32.mrb[49].mxu1  ;;  %v4888_v25 = vmul.f32 %v6930_v12, %v103_v4  ;;  %v104_v9 = vld [vmem:[%s7213_s0 + $0x90] sm:$0xff]  ;;  %v105_v12 = vld [vmem:[%s7213_s0 + $0x98] sm:$0xff] }
 0x33b   :  { %v6980_v1 = vadd.f32 %v4907_v35, %v4883_v14  ;;  %v5253_v61 = vadd.f32 %v3327_v7, %v6957_v22  ;;  %v3329_v62 = vpop.f32.mrb[50].mxu1  ;;  %v116_v14 = vld [vmem:[%s7213_s0 + $0xf0] sm:$0xff]  ;;  %v478_v35 = vadd.f32 %v7264_v44, %v6955_v24  ;;  %v4889_v42 = vmul.f32 %v6932_v18, %v104_v9  ;;  %v7266_v18 = vld [vmem:[#allocation29_spill] sm:$0xff] }
 0x33c   :  { %v6991_v3 = vadd.f32 %v4908_v23, %v4884_v13  ;;  %v4897_v21 = vadd.f32 %v5252_v55, %v350_v27  ;;  %v3330_v36 = vpop.f32.mrb[51].mxu1  ;;  %v117_v27 = vld [vmem:[%s7213_s0 + $0xf8] sm:$0xff] }
 0x33d   :  { %v4898_v26 = vadd.f32 %v5253_v61, %v352_v60  ;;  %v3366_v29 = vpop.f32.mrb[52].mxu0  ;;  %v7265_v61 = vld [vmem:[#allocation27_spill] sm:$0xff] }
 0x33e   :  { %v4909_v20 = vmul.f32 %v4897_v21, %v112_v19  ;;  %v5254_v38 = vadd.f32 %v3366_v29, %v6957_v22  ;;  %v3368_v63 = vpop.f32.mrb[53].mxu0  ;;  %v539_v62 = vadd.f32 %v7265_v61, %v6955_v24  ;;  %v118_v29 = vld [vmem:[%s7213_s0 + $0x100] sm:$0xff] }
 0x33f   :  { %v4910_v8 = vmul.f32 %v4898_v26, %v113_v34  ;;  %v5255_v59 = vadd.f32 %v3368_v63, %v6957_v22  ;;  %v3370_v58 = vpop.f32.mrb[54].mxu0  ;;  %v4890_v34 = vmul.f32 %v6936_v47, %v105_v12  ;;  %v106_v26 = vld [vmem:[%s7213_s0 + $0xa0] sm:$0xff]  ;;  %v107_v47 = vld [vmem:[%s7213_s0 + $0xa8] sm:$0xff] }
 0x340   :  { %v7011_v5 = vadd.f32 %v4909_v20, %v4885_v10  ;;  %v4899_v17 = vadd.f32 %v5254_v38, %v413_v32  ;;  %v3371_v40 = vpop.f32.mrb[55].mxu0  ;;  %v541_v10 = vadd.f32 %v7266_v18, %v6955_v24  ;;  %v119_v63 = vld [vmem:[%s7213_s0 + $0x108] sm:$0xff]  ;;  %v4891_v2 = vmul.f32 %v6943_v49, %v106_v26 }
 0x341   :  { %v7019_v41 = vadd.f32 %v4910_v8, %v4886_v28  ;;  %v4900_v56 = vadd.f32 %v5255_v59, %v415_v37  ;;  %v3407_v57 = vpop.f32.mrb[52].mxu1  ;;  %v7267_v59 = vld [vmem:[#allocation28_spill] sm:$0xff]  ;;  %v7268_v49 = vld [vmem:[#allocation30_spill] sm:$0xff] }
 0x342   :  { %v4911_v48 = vmul.f32 %v4899_v17, %v114_v39  ;;  %v5256_v15 = vadd.f32 %v3407_v57, %v6957_v22  ;;  %v3409_v54 = vpop.f32.mrb[53].mxu1  ;;  %v602_v58 = vadd.f32 %v7267_v59, %v6955_v24  ;;  %v120_v57 = vld [vmem:[%s7213_s0 + $0x110] sm:$0xff] }
 0x343   :  { %v4912_v46 = vmul.f32 %v4900_v56, %v115_v6  ;;  %v5257_v50 = vadd.f32 %v3409_v54, %v6957_v22  ;;  %v3411_v13 = vpop.f32.mrb[54].mxu1  ;;  %v4892_v6 = vmul.f32 %v6947_v51, %v107_v47  ;;  %v108_v56 = vld [vmem:[%s7213_s0 + $0xb0] sm:$0xff]  ;;  %v109_v51 = vld [vmem:[%s7213_s0 + $0xb8] sm:$0xff] }
 0x344   :  { %v7035_v23 = vadd.f32 %v4911_v48, %v4887_v45  ;;  %v4901_v53 = vadd.f32 %v5256_v15, %v476_v11  ;;  %v3412_v55 = vpop.f32.mrb[55].mxu1  ;;  %v604_v45 = vadd.f32 %v7268_v49, %v6955_v24  ;;  %v121_v54 = vld [vmem:[%s7213_s0 + $0x118] sm:$0xff]  ;;  %v4893_v24 = vmul.f32 %v6951_v43, %v108_v56  ;;  %v7099_v13 = vpop.permute.xlu1 %183  ;;  %v122_v43 = vld [vmem:[%s7213_s0 + $0x120] sm:$0xff] }
 0x345   :  { %v7043_v7 = vadd.f32 %v4912_v46, %v4888_v25  ;;  %v4902_v52 = vadd.f32 %v5257_v50, %v478_v35  ;;  %v3448_v19 = vpop.f32.mrb[56].mxu0  ;;  %v7272_v47 = vld [vmem:[#allocation13_spill] sm:$0xff]  ;;  %v7275_v49 = vld [vmem:[#allocation20_spill] sm:$0xff] }
 0x346   :  { %v4913_v60 = vmul.f32 %v4901_v53, %v116_v14  ;;  %v5258_v21 = vadd.f32 %v3448_v19, %v6957_v22  ;;  %v3450_v0 = vpop.f32.mrb[57].mxu0  ;;  %v7101_v53 = vpop.permute.xlu0 %4169  ;;  %v7274_v56 = vld [vmem:[#allocation21_spill] sm:$0xff] }
 0x347   :  { %v4914_v36 = vmul.f32 %v4902_v52, %v117_v27  ;;  %v5259_v20 = vadd.f32 %v3450_v0, %v6957_v22  ;;  %v3452_v16 = vpop.f32.mrb[58].mxu0  ;;  %v7269_v27 = vld [vmem:[#allocation10_spill] sm:$0xff] }
 0x348   :  { %v7059_v32 = vadd.f32 %v4913_v60, %v4889_v42  ;;  %v4903_v38 = vadd.f32 %v5258_v21, %v539_v62  ;;  %v3453_v28 = vpop.f32.mrb[59].mxu0  ;;  %v293_v55 = vadd.f32 %v7269_v27, %v7099_v13  ;;  %v123_v21 = vld [vmem:[%s7213_s0 + $0x128] sm:$0xff] }
 0x349   :  { %v7067_v8 = vadd.f32 %v4914_v36, %v4890_v34  ;;  %v4904_v31 = vadd.f32 %v5259_v20, %v541_v10  ;;  %v3489_v39 = vpop.f32.mrb[56].mxu1 }
 0x34a   :  { %v4915_v37 = vmul.f32 %v4903_v38, %v118_v29  ;;  %v5260_v17 = vadd.f32 %v3489_v39, %v6957_v22  ;;  %v3491_v4 = vpop.f32.mrb[57].mxu1  ;;  %v7271_v29 = vld [vmem:[#allocation12_spill] sm:$0xff] }
 0x34b   :  { %v4916_v40 = vmul.f32 %v4904_v31, %v119_v63  ;;  %v5261_v48 = vadd.f32 %v3491_v4, %v6957_v22  ;;  %v3493_v33 = vpop.f32.mrb[58].mxu1  ;;  %v4894_v22 = vmul.f32 %v6953_v30, %v109_v51  ;;  %v7270_v30 = vld [vmem:[#allocation11_spill] sm:$0xff]  ;;  %v356_v18 = vadd.f32 %v7271_v29, %v7099_v13  ;;  %v7276_v51 = vld [vmem:[#allocation22_spill] sm:$0xff] }
 0x34c   :  { %v7083_v11 = vadd.f32 %v4915_v37, %v4891_v2  ;;  %v4905_v15 = vadd.f32 %v5260_v17, %v602_v58  ;;  %v3494_v25 = vpop.f32.mrb[59].mxu1  ;;  %v295_v42 = vadd.f32 %v7270_v30, %v7099_v13  ;;  %v124_v38 = vld [vmem:[%s7213_s0 + $0x130] sm:$0xff]  ;;  %v358_v63 = vadd.f32 %v7272_v47, %v7099_v13  ;;  %v125_v37 = vld [vmem:[%s7213_s0 + $0x138] sm:$0xff] }
 0x34d   :  { %v7091_v46 = vadd.f32 %v4916_v40, %v4892_v6  ;;  %v4906_v9 = vadd.f32 %v5261_v48, %v604_v45  ;;  %v7273_v58 = vld [vmem:[#allocation19_spill] sm:$0xff]  ;;  %v482_v45 = vadd.f32 %v7275_v49, %v7099_v13 }
 0x34e   :  { %v4917_v14 = vmul.f32 %v4905_v15, %v120_v57  ;;  %v419_v17 = vadd.f32 %v7273_v58, %v7099_v13  ;;  %v421_v57 = vadd.f32 %v7274_v56, %v7099_v13 }
 0x34f   :  { %v4918_v44 = vmul.f32 %v4906_v9, %v121_v54  ;;  %v484_v54 = vadd.f32 %v7276_v51, %v7099_v13 }
 0x350   :  { %v7095_v35 = vadd.f32 %v4917_v14, %v4893_v24 }
 0x351   :  { %v7097_v50 = vadd.f32 %v4918_v44, %v4894_v22  ;;  %v7277_v22 = vld [vmem:[#allocation31_spill] sm:$0xff] }
 0x352   :  { %v7144_v44 = vadd.f32 %v7277_v22, %v7099_v13 }
 0x3b4   :  { %v4647_v12 = vpop.f32.mrb[60].mxu0 }
 0x3b5   :  { %v5262_v52 = vadd.f32 %v4647_v12, %v7101_v53  ;;  %v4649_v19 = vpop.f32.mrb[61].mxu0 }
 0x3b6   :  { %v5263_v60 = vadd.f32 %v4649_v19, %v7101_v53  ;;  %v4651_v61 = vpop.f32.mrb[62].mxu0 }
 0x3b7   :  { %v4931_v62 = vadd.f32 %v5262_v52, %v293_v55  ;;  %v4652_v0 = vpop.f32.mrb[63].mxu0  ;;  %v127_v52 = vld [vmem:[%s7213_s0 + $0x148] sm:$0xff] }
 0x3b8   :  { %v4932_v34 = vadd.f32 %v5263_v60, %v295_v42  ;;  %v4688_v36 = vpop.f32.mrb[60].mxu1 }
 0x3b9   :  { %v4943_v26 = vmul.f32 %v4931_v62, %v122_v43  ;;  %v5264_v10 = vadd.f32 %v4688_v36, %v7101_v53  ;;  %v4690_v20 = vpop.f32.mrb[61].mxu1  ;;  %v7278_v43 = vld [vmem:[#allocation33_spill] sm:$0xff] }
 0x3ba   :  { %v4944_v16 = vmul.f32 %v4932_v34, %v123_v21  ;;  %v5265_v28 = vadd.f32 %v4690_v20, %v7101_v53  ;;  %v4692_v31 = vpop.f32.mrb[62].mxu1  ;;  %v7152_v30 = vadd.f32 %v7278_v43, %v7099_v13  ;;  %v7279_v21 = vld [vmem:[#allocation32_spill] sm:$0xff] }
 0x3bb   :  { %v4955_v39 = vadd.f32 %v4943_v26, %v6980_v1  ;;  %v4933_v2 = vadd.f32 %v5264_v10, %v356_v18  ;;  %v4693_v59 = vpop.f32.mrb[63].mxu1  ;;  %v7157_v0 = vadd.f32 %v7279_v21, %v7099_v13 }
 0x3bc   :  { %v4956_v4 = vadd.f32 %v4944_v16, %v6991_v3  ;;  %v4934_v6 = vadd.f32 %v5265_v28, %v358_v63  ;;  %v4729_v40 = vpop.f32.mrb[64].mxu0  ;;  %v126_v3 = vld [vmem:[%s7213_s0 + $0x140] sm:$0xff]  ;;  %v128_v16 = vld [vmem:[%s7213_s0 + $0x150] sm:$0xff] }
 0x3bd   :  { %v4967_v1 = vrot.slane %v4955_v39, 4  ;;  %v4945_v48 = vmul.f32 %v4933_v2, %v124_v38  ;;  %v5266_v33 = vadd.f32 %v4729_v40, %v7101_v53  ;;  %v4731_v15 = vpop.f32.mrb[65].mxu0 }
 0x3be   :  { %v4973_v25 = vrot.slane %v4956_v4, 4  ;;  %v4946_v9 = vmul.f32 %v4934_v6, %v125_v37  ;;  %v5267_v24 = vadd.f32 %v4731_v15, %v7101_v53  ;;  %v4733_v14 = vpop.f32.mrb[66].mxu0 }
 0x3bf   :  { %v4968_v12 = vadd.f32 %v4967_v1, %v4955_v39  ;;  %v4957_v27 = vadd.f32 %v4945_v48, %v7011_v5  ;;  %v4935_v55 = vadd.f32 %v5266_v33, %v419_v17  ;;  %v4734_v19 = vpop.f32.mrb[67].mxu0  ;;  %v129_v39 = vld [vmem:[%s7213_s0 + $0x158] sm:$0xff]  ;;  %v7280_v33 = vld [vmem:[#allocation34_spill] sm:$0xff] }
 0x3c0   :  { %v4974_v42 = vadd.f32 %v4973_v25, %v4956_v4  ;;  %v4958_v60 = vadd.f32 %v4946_v9, %v7019_v41  ;;  %v4936_v61 = vadd.f32 %v5267_v24, %v421_v57  ;;  %v4770_v62 = vpop.f32.mrb[64].mxu1  ;;  %v610_v15 = vadd.f32 %v7280_v33, %v7099_v13  ;;  %v130_v13 = vld [vmem:[%s7213_s0 + $0x160] sm:$0xff] }
 0x3c1   :  { %v4969_v5 = vrot.slane %v4968_v12, 2  ;;  %v4979_v34 = vrot.slane %v4957_v27, 4  ;;  %v4947_v36 = vmul.f32 %v4935_v55, %v126_v3  ;;  %v5268_v26 = vadd.f32 %v4770_v62, %v7101_v53  ;;  %v4772_v29 = vpop.f32.mrb[65].mxu1 }
 0x3c2   :  { %v4975_v18 = vrot.slane %v4974_v42, 2  ;;  %v4985_v10 = vrot.slane %v4958_v60, 4  ;;  %v4948_v20 = vmul.f32 %v4936_v61, %v127_v52  ;;  %v5269_v41 = vadd.f32 %v4772_v29, %v7101_v53  ;;  %v4774_v38 = vpop.f32.mrb[66].mxu1 }
 0x3c3   :  { %v4970_v47 = vadd.f32 %v4969_v5, %v4968_v12  ;;  %v4980_v63 = vadd.f32 %v4979_v34, %v4957_v27  ;;  %v4959_v28 = vadd.f32 %v4947_v36, %v7035_v23  ;;  %v4937_v31 = vadd.f32 %v5268_v26, %v482_v45  ;;  %v4775_v2 = vpop.f32.mrb[67].mxu1  ;;  %v131_v34 = vld [vmem:[%s7213_s0 + $0x168] sm:$0xff]  ;;  %v132_v36 = vld [vmem:[%s7213_s0 + $0x170] sm:$0xff]  ;;  %v133_v26 = vld [vmem:[%s7213_s0 + $0x178] sm:$0xff] }
 0x3c4   :  { %v4976_v37 = vadd.f32 %v4975_v18, %v4974_v42  ;;  %v4986_v59 = vadd.f32 %v4985_v10, %v4958_v60  ;;  %v4960_v58 = vadd.f32 %v4948_v20, %v7043_v7  ;;  %v4938_v17 = vadd.f32 %v5269_v41, %v484_v54  ;;  %v4811_v4 = vpop.f32.mrb[68].mxu0 }
 0x3c5   :  { %v4971_v6 = vrot.slane %v4970_v47, 1  ;;  %v4981_v40 = vrot.slane %v4980_v63, 2  ;;  %v4991_v56 = vrot.slane %v4959_v28, 4  ;;  %v4949_v57 = vmul.f32 %v4937_v31, %v128_v16  ;;  %v4813_v49 = vpop.f32.mrb[69].mxu0 }
 0x3c6   :  { %v4977_v1 = vrot.slane %v4976_v37, 1  ;;  %v4987_v48 = vrot.slane %v4986_v59, 2  ;;  %v4950_v23 = vmul.f32 %v4938_v17, %v129_v39  ;;  %v4815_v45 = vpop.f32.mrb[70].mxu0  ;;  %v4997_v9 = vrot.slane %v4960_v58, 4 }
 0x3c7   :  { %v4982_v51 = vadd.f32 %v4981_v40, %v4980_v63  ;;  %v4992_v25 = vadd.f32 %v4991_v56, %v4959_v28  ;;  %v4961_v3 = vadd.f32 %v4949_v57, %v7059_v32  ;;  %v4816_v7 = vpop.f32.mrb[71].mxu0  ;;  %v4972_v54 = vadd.f32 %v4971_v6, %v4970_v47 }
 0x3c8   :  { %v4978_v24 = vadd.f32 %v4977_v1, %v4976_v37  ;;  %v4988_v14 = vadd.f32 %v4987_v48, %v4986_v59  ;;  %v4962_v22 = vadd.f32 %v4950_v23, %v7067_v8  ;;  %v4852_v12 = vpop.f32.mrb[68].mxu1  ;;  %v5270_v19 = vadd.f32 %v4811_v4, %v7101_v53 }
 0x3c9   :  { %v4983_v27 = vrot.slane %v4982_v51, 1  ;;  %v4993_v55 = vrot.slane %v4992_v25, 2  ;;  %v5003_v52 = vrot.slane %v4961_v3, 4  ;;  %v4854_v43 = vpop.f32.mrb[69].mxu1  ;;  %v5271_v32 = vadd.f32 %v4813_v49, %v7101_v53 }
 0x3ca   :  { %v5009_v42 = vrot.slane %v4962_v22, 4  ;;  %v5272_v60 = vadd.f32 %v4852_v12, %v7101_v53  ;;  %v5273_v61 = vadd.f32 %v4854_v43, %v7101_v53  ;;  %v4856_v62 = vpop.f32.mrb[70].mxu1  ;;  %v4998_v8 = vadd.f32 %v4997_v9, %v4960_v58 }
 0x3cb   :  { %v5004_v21 = vadd.f32 %v5003_v52, %v4961_v3  ;;  %v4939_v5 = vadd.f32 %v5270_v19, %v7144_v44  ;;  %v4857_v29 = vpop.f32.mrb[71].mxu1  ;;  %v4989_v18 = vrot.slane %v4988_v14, 1  ;;  %v4940_v10 = vadd.f32 %v5271_v32, %v7152_v30 }
 0x3cc   :  { %v5010_v53 = vadd.f32 %v5009_v42, %v4962_v22  ;;  %v4941_v20 = vadd.f32 %v5272_v60, %v7157_v0  ;;  %v4942_v44 = vadd.f32 %v5273_v61, %v610_v15  ;;  %v4984_v38 = vadd.f32 %v4983_v27, %v4982_v51 }
 0x3cd   :  { %v5005_v16 = vrot.slane %v5004_v21, 2  ;;  %v4951_v41 = vmul.f32 %v4939_v5, %v130_v13  ;;  %v4994_v47 = vadd.f32 %v4993_v55, %v4992_v25  ;;  %v4952_v28 = vmul.f32 %v4940_v10, %v131_v34 }
 0x3ce   :  { %v5011_v63 = vrot.slane %v5010_v53, 2  ;;  %v4953_v31 = vmul.f32 %v4941_v20, %v132_v36  ;;  %v4954_v39 = vmul.f32 %v4942_v44, %v133_v26  ;;  %v4990_v59 = vadd.f32 %v4989_v18, %v4988_v14  ;;  %v5059_v18 = vld [vmem:[%s7214_s1 + $0xd0] sm:$0x1]  ;;  %s5570_s1 = scalar_lea.vmem %s5075_s23, 32 }
 0x3cf   :  { %v5006_v2 = vadd.f32 %v5005_v16, %v5004_v21  ;;  %v4963_v37 = vadd.f32 %v4951_v41, %v7083_v11  ;;  %v4999_v58 = vrot.slane %v4998_v8, 2  ;;  %v4964_v4 = vadd.f32 %v4952_v28, %v7091_v46  ;;  %p5572_p2 = scmp.lt.s32.totalorder %s5570_s1, %s5566_s24 }
 0x3d0   :  { %v5012_v17 = vadd.f32 %v5011_v63, %v5010_v53  ;;  %v4965_v30 = vadd.f32 %v4953_v31, %v7095_v35  ;;  %v4966_v0 = vadd.f32 %v4954_v39, %v7097_v50  ;;  %v4995_v56 = vrot.slane %v4994_v47, 1  ;;  %v7281_v53 = vld [vmem:[#allocation14_spill] sm:$0xff] }
 0x3d1   :  { %v5007_v6 = vrot.slane %v5006_v2, 1  ;;  %v5015_v40 = vrot.slane %v4963_v37, 4  ;;  %v5000_v57 = vadd.f32 %v4999_v58, %v4998_v8  ;;  %v5021_v1 = vrot.slane %v4964_v4, 4  ;;  %p5573_p3 = por %p5572_p2, %p5571_p1 }
 0x3d2   :  { %v5013_v49 = vrot.slane %v5012_v17, 1  ;;  %v5027_v48 = vrot.slane %v4965_v30, 4  ;;  %v5033_v23 = vrot.slane %v4966_v0, 4  ;;  %v5039_v15 = vadd.f32 %v4978_v24, %v4972_v54 }
 0x3d3   :  { %v5008_v45 = vadd.f32 %v5007_v6, %v5006_v2  ;;  %v5016_v33 = vadd.f32 %v5015_v40, %v4963_v37  ;;  %v5001_v11 = vrot.slane %v5000_v57, 1  ;;  %v5022_v25 = vadd.f32 %v5021_v1, %v4964_v4  ;;  %p5574_p4 = pnand %p5573_p3, %p5567_p0 }
 0x3d4   :  { %v5014_v51 = vadd.f32 %v5013_v49, %v5012_v17  ;;  %v5028_v9 = vadd.f32 %v5027_v48, %v4965_v30  ;;  %v5034_v46 = vadd.f32 %v5033_v23, %v4966_v0  ;;  %v4996_v35 = vadd.f32 %v4995_v56, %v4994_v47 }
 0x3d5   :  { %v5017_v3 = vrot.slane %v5016_v33, 2  ;;  %v5040_v7 = vadd.f32 %v5039_v15, %v4984_v38  ;;  %v5023_v50 = vrot.slane %v5022_v25, 2  ;;  %v5002_v55 = vadd.f32 %v5001_v11, %v5000_v57 }
 0x3d6   :  { %v5029_v14 = vrot.slane %v5028_v9, 2  ;;  %v5035_v22 = vrot.slane %v5034_v46, 2  ;;  %v5049_v12 = vadd.f32 %v5014_v51, %v5008_v45  ;;  %vm5056_vm8 = vcmp.eq.s32.totalorder %v7281_v53, 1 }
 0x3d7   :  { %v5018_v27 = vadd.f32 %v5017_v3, %v5016_v33  ;;  %v5041_v52 = vadd.f32 %v5040_v7, %v4990_v59  ;;  %v5024_v19 = vadd.f32 %v5023_v50, %v5022_v25  ;;  %vm5046_vm9 = vcmp.eq.s32.totalorder %v7281_v53, 0 }
 0x3d8   :  { %v5030_v43 = vadd.f32 %v5029_v14, %v5028_v9  ;;  %v5036_v42 = vadd.f32 %v5035_v22, %v5034_v46 }
 0x3d9   :  { %v5019_v13 = vrot.slane %v5018_v27, 1  ;;  %v5042_v32 = vadd.f32 %v5041_v52, %v4996_v35  ;;  %v5025_v54 = vrot.slane %v5024_v19, 1 }
 0x3da   :  { %v5031_v24 = vrot.slane %v5030_v43, 1  ;;  %v5037_v62 = vrot.slane %v5036_v42, 1 }
 0x3db   :  { %v5043_v60 = vadd.f32 %v5042_v32, %v5002_v55  ;;  %v5020_v61 = vadd.f32 %v5019_v13, %v5018_v27  ;;  %v5026_v8 = vadd.f32 %v5025_v54, %v5024_v19 }
 0x3dc   :  { %v5032_v21 = vadd.f32 %v5031_v24, %v5030_v43  ;;  %v5038_v34 = vadd.f32 %v5037_v62, %v5036_v42 }
 0x3dd   :  { %5044 = vadd.xlane.f32.xlu1 %v5043_v60  ;;  %v5050_v5 = vadd.f32 %v5049_v12, %v5020_v61 }
 0x3df   :  { %v5051_v36 = vadd.f32 %v5050_v5, %v5026_v8 }
 0x3e1   :  { %v5052_v26 = vadd.f32 %v5051_v36, %v5032_v21 }
 0x3e3   :  { %v5053_v29 = vadd.f32 %v5052_v26, %v5038_v34 }
 0x3e5   :  { %5054 = vadd.xlane.f32.xlu0 %v5053_v29 }
 0x3fb   :  { %5062 = vperm.xlu0 %5474, %v5059_v18  }
 0x46a   :  { %v5045_v20 = vpop.xlane.xlu1 %5044 }
 0x46b   :  { %v5047_v16 = vsel %vm5046_vm9, %v5045_v20, 0.0 }
 0x472   :  { %v5055_v10 = vpop.xlane.xlu0 %5054 }
 0x473   :  { %v5057_v44 = vsel %vm5056_vm8, %v5055_v10, 0.0 }
 0x474   :  { %v5058_v41 = vadd.f32 %v5057_v44, %v5047_v16 }
 0x47a   :  { %v5063_v38 = vpop.permute.xlu0 %5062 }
 0x47b   :  { %v5065_v47 = vadd.f32 %v5063_v38, %v5058_v41 }
 0x47d   :  { %5067 = vst.msk [vmem:[#allocation3] sm:$0x1] %vm5066_vm10, %v5065_v47 }
 0x47e   :  { %5577 = shalt.err (!%p5574_p4)
}
 0x47f   :  { %s5578_s27 = scalar_lea.hbm %s7215_s2, 16 }
 0x480   :  { %p5579_p5 = scmp.ne.s32.totalorder %s7215_s2, %s5578_s27  ;;  %p5582_p6 = scmp.lt.u32.totalorder %s5578_s27, %s7215_s2 }
 0x482   :  { %p5584_p7 = pnand %p5582_p6, %p5579_p5 }
 0x484   :  { %5587 = shalt.err (!%p5584_p7)
}
 0x485   :  { %5077 = dma.vmem_to_hbm [thread:$0]  %s5075_s23, 16, %s7215_s2, [#allocation4]  }
 0x486   :  { %5588 = dma.done.wait [#allocation4], 16  }
 0x487   :  { %5589 = vsyncadd [#allocation4], 4294967280 }
 0x488   :  { %5081 = vsyncpa [#allocation4], 1 }

</bundles_post_ra>
